<compile_context>
chip_gen: v5e
topology: v5e:2x2
jax: 0.10.0
libtpu: 0.0.40
codegen_flags: <defaults>
</compile_context>

<pallas_src>
import jax
import jax.numpy as jnp
import numpy as np
from jax.experimental import pallas as pl
from jax.experimental.pallas import tpu as pltpu


def _round_up(x, m):
    return (x + m - 1) // m * m


def _sigmoid(x):
    # tanh-based logistic (identical math, rides the EUP tanh unit).
    return 0.5 * (jnp.tanh(0.5 * x) + 1.0)


# ----------------------------------------------------------------------------- kernel
def attention_lstm_kernel(
    x_ref,       # (Bp, Kp)  mxu dtype: [attn_in, h_prev, 1.0 (bias col), 0-pad]
    c_prev_ref,  # (Bp, A)   f32
    obj_ref,     # (Bp, N, Dobj) mxu dtype
    mask_ref,    # (Bp, N)   f32, 1.0 = valid object
    wg_ref,      # (Kp, 4A)  mxu dtype: fused [W_i|W_f|W_g|W_o], bias row at K
    wobj_ref,    # (Dobj, A) mxu dtype
    wq_ref,      # (A, A)    mxu dtype
    misc_ref,    # (2, A)    f32: row0 = b_obj + b_q, row1 = w_fin
    b_fin_ref,   # (1, 1)    f32 in SMEM
    h_out_ref, c_out_ref, alpha_ref,   # (Bp, A), (Bp, A), (Bp, N)
):
    A = h_out_ref.shape[1]

    # ---- one fused MXU pass for all four LSTM gates (gate biases ride the
    #      ones-column of x / bias row of W_gates)
    gates = jnp.dot(x_ref[...], wg_ref[...],
                    preferred_element_type=jnp.float32)            # (Bp, 4A) f32

    # A = 128 -> slices are vreg-aligned (free lane slicing)
    i_g = _sigmoid(gates[:, 0 * A:1 * A])
    f_g = _sigmoid(gates[:, 1 * A:2 * A])
    g_g = jnp.tanh(gates[:, 2 * A:3 * A])
    o_g = _sigmoid(gates[:, 3 * A:4 * A])

    c_new = f_g * c_prev_ref[...] + i_g * g_g                      # f32 state math
    h_new = o_g * jnp.tanh(c_new)
    c_out_ref[...] = c_new
    h_out_ref[...] = h_new

    # ---- additive attention over the N object encodings
    misc = misc_ref[...]
    b_oq = misc[0:1, :]           # b_obj + b_q (pre-summed)        (1, A)
    w_fin = misc[1:2, :]          # final_attn_fc weight            (1, A)

    objk = jax.lax.dot_general(
        obj_ref[...], wobj_ref[...],
        dimension_numbers=(((2,), (0,)), ((), ())),
        preferred_element_type=jnp.float32)                        # (Bp, N, A)
    q = jnp.dot(h_new.astype(wq_ref.dtype), wq_ref[...],
                preferred_element_type=jnp.float32) + b_oq         # (Bp, A)
    t = jnp.tanh(objk + q[:, None, :])                             # (Bp, N, A)
    scores = jnp.sum(t * w_fin[None], axis=-1) + b_fin_ref[0, 0]   # (Bp, N)

    # masked softmax over the object axis
    # TODO(synk): masked_softmax is defined outside this module; implemented as
    #             softmax over mask-valid positions (invalid scores -> -1e30,
    #             an all-masked row yields alpha = 0 everywhere, no NaN).
    mask = mask_ref[...]
    neg = jnp.where(mask > 0.5, scores, jnp.full_like(scores, -1e30))
    s_max = jnp.max(neg, axis=-1, keepdims=True)                   # (Bp, 1)
    p = jnp.exp(neg - s_max) * mask
    denom = jnp.maximum(jnp.sum(p, axis=-1, keepdims=True), 1e-30)
    # exact division (review correctness concern: rows must sum to 1 exactly)
    alpha_ref[...] = p / denom


# ----------------------------------------------------------------------------- param packing
def pack_params(params, mxu_dtype=jnp.bfloat16):
    """Fuse / pad the raw per-gate parameters into the kernel's operand set."""
    A = params["W_q"].shape[0]
    K = params["W_i"].shape[0]
    Kp = _round_up(K + 1, 128)          # +1 = bias row; pad contraction to 128-mult

    w_gates = jnp.concatenate(
        [params["W_i"], params["W_f"], params["W_g"], params["W_o"]], axis=1)   # (K, 4A)
    b_gates = jnp.concatenate(
        [params["b_i"], params["b_f"], params["b_g"], params["b_o"]], axis=1)   # (1, 4A)
    wg = jnp.zeros((Kp, 4 * A), jnp.float32)
    wg = wg.at[:K].set(w_gates).at[K:K + 1].set(b_gates)

    misc = jnp.concatenate([params["b_obj"] + params["b_q"], params["w_fin"]],
                           axis=0)                                              # (2, A)
    return {
        "A": A, "K": K, "Kp": Kp, "mxu_dtype": mxu_dtype,
        "W_gates": wg.astype(mxu_dtype),
        "W_obj": params["W_obj"].astype(mxu_dtype),
        "W_q": params["W_q"].astype(mxu_dtype),
        "misc": misc.astype(jnp.float32),
        "b_fin": params["b_fin"].astype(jnp.float32),
    }


# ----------------------------------------------------------------------------- wrapper
def attention_lstm_pallas(packed, meanimfeats, sent_enc, obj_enc, obj_enc_mask,
                          seq_t, lang_lstm_hidden_t_1, attn_lstm_hidden=None,
                          use_z=True):
    B = meanimfeats.shape[0]
    A, K, Kp = packed["A"], packed["K"], packed["Kp"]
    N, Dobj = obj_enc.shape[1], obj_enc.shape[2]
    mxu_dtype = packed["mxu_dtype"]
    Bp = _round_up(max(B, 1), 8)        # fill f32 sublanes; padded rows masked off

    if attn_lstm_hidden is None:
        h_prev = jnp.zeros((B, A), jnp.float32)
        c_prev = jnp.zeros((B, A), jnp.float32)
    else:
        h_prev = attn_lstm_hidden[0][:B]
        c_prev = attn_lstm_hidden[1][:B]

    if use_z:
        attn_in = jnp.concatenate(
            [meanimfeats, sent_enc, seq_t, lang_lstm_hidden_t_1], axis=1)
    else:
        attn_in = jnp.concatenate([meanimfeats, seq_t, lang_lstm_hidden_t_1], axis=1)

    x = jnp.concatenate([attn_in, h_prev], axis=1)          # (B, K)
    assert x.shape[1] == K, (x.shape, K)

    # [x | 1.0 (bias col) | 0-pad to Kp], batch zero-padded to Bp
    x_comb = jnp.zeros((Bp, Kp), jnp.float32)
    x_comb = x_comb.at[:B, :K].set(x).at[:B, K].set(1.0)
    x_comb = x_comb.astype(mxu_dtype)

    c_prev_p = jnp.zeros((Bp, A), jnp.float32).at[:B].set(c_prev)
    obj_p = jnp.zeros((Bp, N, Dobj), jnp.float32).at[:B].set(obj_enc).astype(mxu_dtype)
    mask_p = jnp.zeros((Bp, N), jnp.float32).at[:B].set(obj_enc_mask.astype(jnp.float32))

    vmem = pl.BlockSpec(memory_space=pltpu.MemorySpace.VMEM)
    smem = pl.BlockSpec(memory_space=pltpu.MemorySpace.SMEM)

    # NOTE: if this cell is ever stepped inside a decode/time loop, fold that
    # loop into a grid=(T,) "arbitrary" axis with constant weight index_maps so
    # the ~0.3 MB of weights stays VMEM-resident across steps (review item 4).
    # As a standalone single step there is no loop to fuse.
    h_new, c_new, alpha = pl.pallas_call(
        attention_lstm_kernel,
        out_shape=(jax.ShapeDtypeStruct((Bp, A), jnp.float32),
                   jax.ShapeDtypeStruct((Bp, A), jnp.float32),
                   jax.ShapeDtypeStruct((Bp, N), jnp.float32)),
        in_specs=[vmem, vmem, vmem, vmem, vmem, vmem, vmem, vmem, smem],
        out_specs=(vmem, vmem, vmem),
    )(x_comb, c_prev_p, obj_p, mask_p,
      packed["W_gates"], packed["W_obj"], packed["W_q"], packed["misc"],
      packed["b_fin"])

    return (h_new[:B], c_new[:B]), alpha[:B]


# ----------------------------------------------------------------------------- reference (pure JAX)
def ref_forward(params, meanimfeats, sent_enc, obj_enc, obj_enc_mask, seq_t,
                lang_lstm_hidden_t_1, attn_lstm_hidden=None, use_z=True,
                mxu_dtype=jnp.float32):
    B = meanimfeats.shape[0]
    A = params["W_q"].shape[0]
    if attn_lstm_hidden is None:
        h_prev = jnp.zeros((B, A), jnp.float32)
        c_prev = jnp.zeros((B, A), jnp.float32)
    else:
        h_prev = attn_lstm_hidden[0][:B]
        c_prev = attn_lstm_hidden[1][:B]
    if use_z:
        attn_in = jnp.concatenate(
            [meanimfeats, sent_enc, seq_t, lang_lstm_hidden_t_1], axis=1)
    else:
        attn_in = jnp.concatenate([meanimfeats, seq_t, lang_lstm_hidden_t_1], axis=1)
    x = jnp.concatenate([attn_in, h_prev], axis=1).astype(mxu_dtype)

    def mm(a, w):
        return jnp.dot(a, w.astype(mxu_dtype), preferred_element_type=jnp.float32)

    i_g = _sigmoid(mm(x, params["W_i"]) + params["b_i"])
    f_g = _sigmoid(mm(x, params["W_f"]) + params["b_f"])
    g_g = jnp.tanh(mm(x, params["W_g"]) + params["b_g"])
    o_g = _sigmoid(mm(x, params["W_o"]) + params["b_o"])
    c_new = f_g * c_prev + i_g * g_g
    h_new = o_g * jnp.tanh(c_new)

    objk = jax.lax.dot_general(
        obj_enc.astype(mxu_dtype), params["W_obj"].astype(mxu_dtype),
        dimension_numbers=(((2,), (0,)), ((), ())),
        preferred_element_type=jnp.float32) + params["b_obj"][None]
    q = mm(h_new.astype(mxu_dtype), params["W_q"]) + params["b_q"]
    t = jnp.tanh(objk + q[:, None, :])
    scores = jnp.sum(t * params["w_fin"][None], axis=-1) + params["b_fin"]

    mask = obj_enc_mask.astype(jnp.float32)
    neg = jnp.where(mask > 0.5, scores, -1e30)
    s_max = jnp.max(neg, axis=-1, keepdims=True)
    p = jnp.exp(neg - s_max) * mask
    denom = jnp.maximum(jnp.sum(p, axis=-1, keepdims=True), 1e-30)
    alpha = p / denom
    return (h_new, c_new), alpha


# ----------------------------------------------------------------------------- params
def init_params(key, meanimfeats_size, sent_enc_size, seq_size, lang_lstm_size,
                obj_enc_size, attention_dim, use_z=True):
    if use_z:
        attn_in_dim = meanimfeats_size + sent_enc_size + seq_size + lang_lstm_size
    else:
        attn_in_dim = meanimfeats_size + seq_size + lang_lstm_size
    K = attn_in_dim + attention_dim       # combined [input ; h_prev] LSTMCell rows
    A = attention_dim
    ks = jax.random.split(key, 16)

    def w(k, shape, scale=0.08):
        return (scale * jax.random.normal(k, shape)).astype(jnp.float32)

    return {
        # per-gate combined LSTMCell weights: rows [0:attn_in_dim] = W_ih.T
        # chunk, rows [attn_in_dim:] = W_hh.T chunk; bias = b_ih + b_hh chunk.
        "W_i": w(ks[0], (K, A)), "b_i": w(ks[1], (1, A)),
        "W_f": w(ks[2], (K, A)), "b_f": w(ks[3], (1, A)),
        "W_g": w(ks[4], (K, A)), "b_g": w(ks[5], (1, A)),
        "W_o": w(ks[6], (K, A)), "b_o": w(ks[7], (1, A)),
        "W_obj": w(ks[8], (obj_enc_size, A)), "b_obj": w(ks[9], (1, A)),
        "W_q":   w(ks[10], (A, A)),           "b_q":   w(ks[11], (1, A)),
        "w_fin": w(ks[12], (1, A)),           "b_fin": w(ks[13], (1, 1)),
    }


# ----------------------------------------------------------------------------- main
if __name__ == "__main__":
    B, N_OBJ = 2, 12
    MEANIM, SENT, SEQ, LANG = 16, 16, 16, 32
    OBJ_ENC = 32
    ATT = 128                                   # attention_dim (lane-dense)

    key = jax.random.PRNGKey(0)
    k_par, k_mi, k_se, k_oe, k_mask, k_sq, k_lh = jax.random.split(key, 7)

    params = init_params(k_par, MEANIM, SENT, SEQ, LANG, OBJ_ENC, ATT, use_z=True)

    meanimfeats = jax.random.normal(k_mi, (B, MEANIM), jnp.float32)
    sent_enc = jax.random.normal(k_se, (B, SENT), jnp.float32)
    obj_enc = jax.random.normal(k_oe, (B, N_OBJ, OBJ_ENC), jnp.float32)
    obj_enc_mask = (jax.random.uniform(k_mask, (B, N_OBJ)) > 0.35).astype(jnp.float32)
    obj_enc_mask = obj_enc_mask.at[:, 0].set(1.0)   # at least one valid object per row
    seq_t = jax.random.normal(k_sq, (B, SEQ), jnp.float32)
    lang_h = jax.random.normal(k_lh, (B, LANG), jnp.float32)

    # ---------------- f32 MXU path: tight check of the module semantics --------
    packed_f32 = pack_params(params, mxu_dtype=jnp.float32)
    (h1, c1), alpha1 = attention_lstm_pallas(
        packed_f32, meanimfeats, sent_enc, obj_enc, obj_enc_mask, seq_t, lang_h,
        attn_lstm_hidden=None)
    (h2, c2), alpha2 = attention_lstm_pallas(
        packed_f32, meanimfeats, sent_enc, obj_enc, obj_enc_mask, seq_t, lang_h,
        attn_lstm_hidden=(h1, c1))
    h1, c1, alpha1, h2, c2, alpha2 = jax.block_until_ready(
        (h1, c1, alpha1, h2, c2, alpha2))

    (rh1, rc1), ra1 = ref_forward(params, meanimfeats, sent_enc, obj_enc,
                                  obj_enc_mask, seq_t, lang_h, None)
    (rh2, rc2), ra2 = ref_forward(params, meanimfeats, sent_enc, obj_enc,
                                  obj_enc_mask, seq_t, lang_h, (rh1, rc1))

    np.testing.assert_allclose(np.asarray(h1), np.asarray(rh1), atol=1e-4, rtol=1e-4)
    np.testing.assert_allclose(np.asarray(c1), np.asarray(rc1), atol=1e-4, rtol=1e-4)
    np.testing.assert_allclose(np.asarray(h2), np.asarray(rh2), atol=1e-4, rtol=1e-4)
    np.testing.assert_allclose(np.asarray(c2), np.asarray(rc2), atol=1e-4, rtol=1e-4)
    np.testing.assert_allclose(np.asarray(alpha1), np.asarray(ra1), atol=1e-3, rtol=1e-3)
    np.testing.assert_allclose(np.asarray(alpha2), np.asarray(ra2), atol=1e-3, rtol=1e-3)

    # ---------------- default bf16 MXU path (production config) ----------------
    packed_bf16 = pack_params(params)           # mxu_dtype = bf16 by default
    (hb, cb), alphab = attention_lstm_pallas(
        packed_bf16, meanimfeats, sent_enc, obj_enc, obj_enc_mask, seq_t, lang_h,
        attn_lstm_hidden=None)
    hb, cb, alphab = jax.block_until_ready((hb, cb, alphab))
    (rhb, rcb), rab = ref_forward(params, meanimfeats, sent_enc, obj_enc,
                                  obj_enc_mask, seq_t, lang_h, None,
                                  mxu_dtype=jnp.bfloat16)
    np.testing.assert_allclose(np.asarray(hb), np.asarray(rhb), atol=5e-3, rtol=5e-3)
    np.testing.assert_allclose(np.asarray(cb), np.asarray(rcb), atol=5e-3, rtol=5e-3)
    np.testing.assert_allclose(np.asarray(alphab), np.asarray(rab), atol=5e-3, rtol=5e-3)

    print("KERNEL_OK")
</pallas_src>

<mosaic_0001>
module attributes {stable_mosaic.version = 11 : i64} {
  func.func @attention_lstm_kernel(%arg0: memref<8x256xf32, #tpu.memory_space<vmem>>, %arg1: memref<8x128xf32, #tpu.memory_space<vmem>>, %arg2: memref<8x12x32xf32, #tpu.memory_space<vmem>>, %arg3: memref<8x12xf32, #tpu.memory_space<vmem>>, %arg4: memref<256x512xf32, #tpu.memory_space<vmem>>, %arg5: memref<32x128xf32, #tpu.memory_space<vmem>>, %arg6: memref<128x128xf32, #tpu.memory_space<vmem>>, %arg7: memref<2x128xf32, #tpu.memory_space<vmem>>, %arg8: memref<1x1xf32, #tpu.memory_space<smem>>, %arg9: memref<8x128xf32, #tpu.memory_space<vmem>>, %arg10: memref<8x128xf32, #tpu.memory_space<vmem>>, %arg11: memref<8x12xf32, #tpu.memory_space<vmem>>) attributes {dimension_semantics = [], scalar_prefetch = 0 : i64, scratch_operands = 0 : i64, tpu.core_type = #tpu.core_type<tc>} {
    %c0 = arith.constant 0 : index
    %c0_0 = arith.constant 0 : index
    %0 = vector.load %arg0[%c0, %c0_0] : memref<8x256xf32, #tpu.memory_space<vmem>>, vector<8x256xf32>
    %c0_1 = arith.constant 0 : index
    %c0_2 = arith.constant 0 : index
    %1 = vector.load %arg4[%c0_1, %c0_2] : memref<256x512xf32, #tpu.memory_space<vmem>>, vector<256x512xf32>
    %cst = arith.constant dense<0.000000e+00> : vector<8x512xf32>
    %2 = tpu.matmul %0, %1, %cst {dimension_numbers = #tpu.dot_dimension_numbers<[1], [0], [0], [1], [0, 0, 1, 1], [], []>} : vector<8x256xf32>, vector<256x512xf32>, vector<8x512xf32> -> vector<8x512xf32>
    %3 = vector.extract_strided_slice %2 {offsets = [0, 0], sizes = [8, 128], strides = [1, 1]} : vector<8x512xf32> to vector<8x128xf32>
    %cst_3 = arith.constant 5.000000e-01 : f32
    %4 = vector.broadcast %cst_3 : f32 to vector<8x128xf32>
    %5 = arith.mulf %4, %3 : vector<8x128xf32>
    %6 = math.tanh %5 : vector<8x128xf32>
    %cst_4 = arith.constant 1.000000e+00 : f32
    %7 = vector.broadcast %cst_4 : f32 to vector<8x128xf32>
    %8 = arith.addf %6, %7 : vector<8x128xf32>
    %cst_5 = arith.constant 5.000000e-01 : f32
    %9 = vector.broadcast %cst_5 : f32 to vector<8x128xf32>
    %10 = arith.mulf %9, %8 : vector<8x128xf32>
    %11 = vector.extract_strided_slice %2 {offsets = [0, 128], sizes = [8, 128], strides = [1, 1]} : vector<8x512xf32> to vector<8x128xf32>
    %cst_6 = arith.constant 5.000000e-01 : f32
    %12 = vector.broadcast %cst_6 : f32 to vector<8x128xf32>
    %13 = arith.mulf %12, %11 : vector<8x128xf32>
    %14 = math.tanh %13 : vector<8x128xf32>
    %cst_7 = arith.constant 1.000000e+00 : f32
    %15 = vector.broadcast %cst_7 : f32 to vector<8x128xf32>
    %16 = arith.addf %14, %15 : vector<8x128xf32>
    %cst_8 = arith.constant 5.000000e-01 : f32
    %17 = vector.broadcast %cst_8 : f32 to vector<8x128xf32>
    %18 = arith.mulf %17, %16 : vector<8x128xf32>
    %19 = vector.extract_strided_slice %2 {offsets = [0, 256], sizes = [8, 128], strides = [1, 1]} : vector<8x512xf32> to vector<8x128xf32>
    %20 = math.tanh %19 : vector<8x128xf32>
    %21 = vector.extract_strided_slice %2 {offsets = [0, 384], sizes = [8, 128], strides = [1, 1]} : vector<8x512xf32> to vector<8x128xf32>
    %cst_9 = arith.constant 5.000000e-01 : f32
    %22 = vector.broadcast %cst_9 : f32 to vector<8x128xf32>
    %23 = arith.mulf %22, %21 : vector<8x128xf32>
    %24 = math.tanh %23 : vector<8x128xf32>
    %cst_10 = arith.constant 1.000000e+00 : f32
    %25 = vector.broadcast %cst_10 : f32 to vector<8x128xf32>
    %26 = arith.addf %24, %25 : vector<8x128xf32>
    %cst_11 = arith.constant 5.000000e-01 : f32
    %27 = vector.broadcast %cst_11 : f32 to vector<8x128xf32>
    %28 = arith.mulf %27, %26 : vector<8x128xf32>
    %c0_12 = arith.constant 0 : index
    %c0_13 = arith.constant 0 : index
    %29 = vector.load %arg1[%c0_12, %c0_13] : memref<8x128xf32, #tpu.memory_space<vmem>>, vector<8x128xf32>
    %30 = arith.mulf %18, %29 : vector<8x128xf32>
    %31 = arith.mulf %10, %20 : vector<8x128xf32>
    %32 = arith.addf %30, %31 : vector<8x128xf32>
    %33 = math.tanh %32 : vector<8x128xf32>
    %34 = arith.mulf %28, %33 : vector<8x128xf32>
    %c0_14 = arith.constant 0 : index
    %c0_15 = arith.constant 0 : index
    %35 = vector.load %arg10[%c0_14, %c0_15] : memref<8x128xf32, #tpu.memory_space<vmem>>, vector<8x128xf32>
    tpu.vector_store %arg10[%c0_14, %c0_15], %32 {strides = array<i32>} : memref<8x128xf32, #tpu.memory_space<vmem>>, vector<8x128xf32>,
    %c0_16 = arith.constant 0 : index
    %c0_17 = arith.constant 0 : index
    %36 = vector.load %arg9[%c0_16, %c0_17] : memref<8x128xf32, #tpu.memory_space<vmem>>, vector<8x128xf32>
    tpu.vector_store %arg9[%c0_16, %c0_17], %34 {strides = array<i32>} : memref<8x128xf32, #tpu.memory_space<vmem>>, vector<8x128xf32>,
    %c0_18 = arith.constant 0 : index
    %c0_19 = arith.constant 0 : index
    %37 = vector.load %arg7[%c0_18, %c0_19] : memref<2x128xf32, #tpu.memory_space<vmem>>, vector<2x128xf32>
    %38 = vector.extract_strided_slice %37 {offsets = [0, 0], sizes = [1, 128], strides = [1, 1]} : vector<2x128xf32> to vector<1x128xf32>
    %39 = vector.extract_strided_slice %37 {offsets = [1, 0], sizes = [1, 128], strides = [1, 1]} : vector<2x128xf32> to vector<1x128xf32>
    %c0_20 = arith.constant 0 : index
    %c0_21 = arith.constant 0 : index
    %c0_22 = arith.constant 0 : index
    %40 = vector.load %arg2[%c0_20, %c0_21, %c0_22] : memref<8x12x32xf32, #tpu.memory_space<vmem>>, vector<8x12x32xf32>
    %c0_23 = arith.constant 0 : index
    %c0_24 = arith.constant 0 : index
    %41 = vector.load %arg5[%c0_23, %c0_24] : memref<32x128xf32, #tpu.memory_space<vmem>>, vector<32x128xf32>
    %cst_25 = arith.constant dense<0.000000e+00> : vector<8x12x128xf32>
    %42 = tpu.matmul %40, %41, %cst_25 {dimension_numbers = #tpu.dot_dimension_numbers<[2], [0], [0, 1], [1], [0, 0, 0, 1, 1, 1], [], []>} : vector<8x12x32xf32>, vector<32x128xf32>, vector<8x12x128xf32> -> vector<8x12x128xf32>
    %c0_26 = arith.constant 0 : index
    %c0_27 = arith.constant 0 : index
    %43 = vector.load %arg6[%c0_26, %c0_27] : memref<128x128xf32, #tpu.memory_space<vmem>>, vector<128x128xf32>
    %cst_28 = arith.constant dense<0.000000e+00> : vector<8x128xf32>
    %44 = tpu.matmul %34, %43, %cst_28 {dimension_numbers = #tpu.dot_dimension_numbers<[1], [0], [0], [1], [0, 0, 1, 1], [], []>} : vector<8x128xf32>, vector<128x128xf32>, vector<8x128xf32> -> vector<8x128xf32>
    %45 = vector.broadcast %38 : vector<1x128xf32> to vector<8x128xf32>
    %46 = arith.addf %44, %45 : vector<8x128xf32>
    %47 = vector.shape_cast %46 : vector<8x128xf32> to vector<8x1x128xf32>
    %48 = vector.broadcast %47 : vector<8x1x128xf32> to vector<8x12x128xf32>
    %49 = arith.addf %42, %48 : vector<8x12x128xf32>
    %50 = math.tanh %49 : vector<8x12x128xf32>
    %51 = vector.shape_cast %39 : vector<1x128xf32> to vector<1x1x128xf32>
    %52 = vector.broadcast %51 : vector<1x1x128xf32> to vector<8x12x128xf32>
    %53 = arith.mulf %50, %52 : vector<8x12x128xf32>
    %cst_29 = arith.constant dense<0.000000e+00> : vector<8x12xf32>
    %54 = vector.multi_reduction <add>, %53, %cst_29 [2] : vector<8x12x128xf32> to vector<8x12xf32>
    %c0_30 = arith.constant 0 : index
    %c0_31 = arith.constant 0 : index
    %55 = memref.load %arg8[%c0_30, %c0_31] : memref<1x1xf32, #tpu.memory_space<smem>>
    %56 = vector.broadcast %55 : f32 to vector<8x12xf32>
    %57 = arith.addf %54, %56 : vector<8x12xf32>
    %c0_32 = arith.constant 0 : index
    %c0_33 = arith.constant 0 : index
    %58 = vector.load %arg3[%c0_32, %c0_33] : memref<8x12xf32, #tpu.memory_space<vmem>>, vector<8x12xf32>
    %cst_34 = arith.constant 5.000000e-01 : f32
    %59 = vector.broadcast %cst_34 : f32 to vector<8x12xf32>
    %60 = arith.cmpf ogt, %58, %59 : vector<8x12xf32>
    %cst_35 = arith.constant -1.000000e+30 : f32
    %61 = vector.broadcast %cst_35 : f32 to vector<8x12xf32>
    %62 = arith.select %60, %57, %61 : vector<8x12xi1>, vector<8x12xf32>
    %cst_36 = arith.constant dense<0xFF800000> : vector<8xf32>
    %63 = vector.multi_reduction <maximumf>, %62, %cst_36 [1] : vector<8x12xf32> to vector<8xf32>
    %64 = vector.shape_cast %63 : vector<8xf32> to vector<8x1xf32>
    %65 = vector.broadcast %64 : vector<8x1xf32> to vector<8x12xf32>
    %66 = arith.subf %62, %65 : vector<8x12xf32>
    %67 = math.exp %66 : vector<8x12xf32>
    %68 = arith.mulf %67, %58 : vector<8x12xf32>
    %cst_37 = arith.constant dense<0.000000e+00> : vector<8xf32>
    %69 = vector.multi_reduction <add>, %68, %cst_37 [1] : vector<8x12xf32> to vector<8xf32>
    %70 = vector.shape_cast %69 : vector<8xf32> to vector<8x1xf32>
    %cst_38 = arith.constant 1.000000e-30 : f32
    %71 = vector.broadcast %cst_38 : f32 to vector<8x1xf32>
    %72 = arith.maximumf %70, %71 : vector<8x1xf32>
    %73 = vector.broadcast %72 : vector<8x1xf32> to vector<8x12xf32>
    %74 = arith.divf %68, %73 : vector<8x12xf32>
    %c0_39 = arith.constant 0 : index
    %c0_40 = arith.constant 0 : index
    %75 = vector.load %arg11[%c0_39, %c0_40] : memref<8x12xf32, #tpu.memory_space<vmem>>, vector<8x12xf32>
    tpu.vector_store %arg11[%c0_39, %c0_40], %74 {strides = array<i32>} : memref<8x12xf32, #tpu.memory_space<vmem>>, vector<8x12xf32>,
    return
  }
}

</mosaic_0001>

<bundles_post_ra>
// kernel: tpu_custom_call.1
= control target key start
LH: loop header
LB: loop body
LE: loop exit
PB: predicated region body
PF: predicated region fallthrough
CT: control target
= control target key end

     0   :  { %18 = vsyncpa [#allocation4], 0  ;;  %s1504_s0 = inlined_call_operand.vmem [shape: f32[8,256], index: 0, kind: input, shape index: {}]   ;;  %s1505_s1 = inlined_call_operand.vmem [shape: f32[8,128], index: 1, kind: input, shape index: {}]   ;;  %s1506_s2 = inlined_call_operand.vmem [shape: f32[8,12,32], index: 2, kind: input, shape index: {}]   ;;  %s1507_s3 = inlined_call_operand.vmem [shape: f32[8,12], index: 3, kind: input, shape index: {}]   ;;  %s1508_s4 = inlined_call_operand.hbm [shape: f32[256,512], index: 4, kind: input, shape index: {}]   ;;  %s1509_s5 = inlined_call_operand.vmem [shape: f32[32,128], index: 5, kind: input, shape index: {}]   ;;  %s1510_s6 = inlined_call_operand.vmem [shape: f32[128,128], index: 6, kind: input, shape index: {}]   ;;  %s1511_s7 = inlined_call_operand.vmem [shape: f32[2,128], index: 7, kind: input, shape index: {}]   ;;  %s1512_s8 = inlined_call_operand.<no memory space> [shape: f32[1,1], index: 8, kind: input, shape index: {}]   ;;  %s1513_s9 = inlined_call_operand.hbm [shape: f32[8,128], index: 9, kind: output, shape index: {0}]   ;;  %s1514_s10 = inlined_call_operand.hbm [shape: f32[8,128], index: 10, kind: output, shape index: {1}]   ;;  %s1515_s11 = inlined_call_operand.hbm [shape: f32[8,12], index: 11, kind: output, shape index: {2}]  }
   0x1   :  { %19 = vsyncpa [#allocation5], 0 }
   0x2   :  { %20 = vsyncpa [#allocation8], 0  ;;  %s33_s19 = sshll.u32 %s1508_s4, 4  ;;  %s1199_s20 = smov [#allocation3]   ;;  %s34_s19 = int_to_ptr.hbm [resolvable:$true] %s33_s19 }
   0x3   :  { %s35_s21 = sshll.u32 %s1199_s20, 4  ;;  %s1200_s22 = smov 512   ;;  %s36_s21 = int_to_ptr.vmem [resolvable:$true] %s35_s21 }
   0x4   :  { %s1201_s23 = smov 32  }
   0x5   :  { %41 = dma.hbm_to_vmem [thread:$0]  %s34_s19, 16384, %s36_s21, [#allocation4], %s1200_s22, %s1200_s22, %s1201_s23  }
   0x6   :  { %1193 = dma.done.wait [#allocation4], 16384  }
   0x7   :  { %1194 = vsyncadd [#allocation4], 4294950912  ;;  %v180_v0 = vld [vmem:[#allocation3 + $0x3e0] sm:$0xff]  ;;  %v181_v1 = vld [vmem:[#allocation3 + $0x3e8] sm:$0xff]  ;;  %vm569_vm0 = vcmask 261120   ;;  %vm822_vm1 = vcmask 1043456  }
   0x8   :  { %v176_v2 = vld [vmem:[#allocation3 + $0x3c0] sm:$0xff]  ;;  %204 = vmatpush.msra.mxu2 %v180_v0  ;;  %244 = vmatpush.msra.mxu3 %v181_v1  ;;  %v177_v3 = vld [vmem:[#allocation3 + $0x3c8] sm:$0xff]  ;;  %v182_v46 = vld [vmem:[#allocation3 + $0x3f0] sm:$0xff]  ;;  %vm902_vm2 = vcmask 130112   ;;  %vm925_vm3 = vcmask 1041409   ;;  %vm927_vm4 = vcmask 1042434  }
   0x9   :  { %v172_v4 = vld [vmem:[#allocation3 + $0x3a0] sm:$0xff]  ;;  %v173_v5 = vld [vmem:[#allocation3 + $0x3a8] sm:$0xff]  ;;  %v178_v50 = vld [vmem:[#allocation3 + $0x3d0] sm:$0xff]  ;;  %vm929_vm5 = vcmask 1043459   ;;  %vm931_vm6 = vcmask 1044484   ;;  %vm933_vm7 = vcmask 1045509  }
   0xa   :  { %205 = vmatpush.msra.mxu2 %v176_v2  ;;  %245 = vmatpush.msra.mxu3 %v177_v3  ;;  %v168_v6 = vld [vmem:[#allocation3 + $0x380] sm:$0xff]  ;;  %v169_v7 = vld [vmem:[#allocation3 + $0x388] sm:$0xff]  ;;  %v174_v53 = vld [vmem:[#allocation3 + $0x3b0] sm:$0xff]  ;;  %vm935_vm8 = vcmask 1046534   ;;  %vm937_vm9 = vcmask 1047559   ;;  %vm941_vm11 = vcmask 97280  }
   0xb   :  { %v116_v8 = vld [vmem:[#allocation3 + $0x1e0] sm:$0xff]  ;;  %v165_v11 = vld [vmem:[#allocation3 + $0x368] sm:$0xff]  ;;  %v170_v56 = vld [vmem:[#allocation3 + $0x390] sm:$0xff]  ;;  %s987_s17 = sshll.u32 %s1514_s10, 4  ;;  %s1202_s18 = smov [#allocation7]   ;;  %s988_s17 = int_to_ptr.hbm [resolvable:$true] %s987_s17 }
   0xc   :  { %206 = vmatpush.msra.mxu2 %v172_v4  ;;  %246 = vmatpush.msra.mxu3 %v173_v5  ;;  %v112_v9 = vld [vmem:[#allocation3 + $0x1c0] sm:$0xff]  ;;  %v161_v14 = vld [vmem:[#allocation3 + $0x348] sm:$0xff]  ;;  %v118_v57 = vld [vmem:[#allocation3 + $0x1f0] sm:$0xff]  ;;  %s985_s19 = sshll.u32 %s1202_s18, 4  ;;  %s1203_s20 = smov [#allocation6]   ;;  %s986_s19 = int_to_ptr.vmem [resolvable:$true] %s985_s19 }
   0xd   :  { %v164_v10 = vld [vmem:[#allocation3 + $0x360] sm:$0xff]  ;;  %184 = vmatpush.msra.mxu0 %v116_v8  ;;  %v157_v17 = vld [vmem:[#allocation3 + $0x328] sm:$0xff]  ;;  %v166_v59 = vld [vmem:[#allocation3 + $0x370] sm:$0xff]  ;;  %s976_s23 = sshll.u32 %s1513_s9, 4  ;;  %s1204_s10 = smov [#allocation9]   ;;  %s977_s23 = int_to_ptr.hbm [resolvable:$true] %s976_s23 }
   0xe   :  { %207 = vmatpush.msra.mxu2 %v168_v6  ;;  %247 = vmatpush.msra.mxu3 %v169_v7  ;;  %v108_v12 = vld [vmem:[#allocation3 + $0x1a0] sm:$0xff]  ;;  %v153_v20 = vld [vmem:[#allocation3 + $0x308] sm:$0xff]  ;;  %v114_v60 = vld [vmem:[#allocation3 + $0x1d0] sm:$0xff]  ;;  %s996_s4 = sshll.u32 %s1204_s10, 4  ;;  %s998_s25 = sshll.u32 %s1515_s11, 4  ;;  %s997_s4 = int_to_ptr.vmem [resolvable:$true] %s996_s4  ;;  %s999_s25 = int_to_ptr.hbm [resolvable:$true] %s998_s25 }
   0xf   :  { %v160_v13 = vld [vmem:[#allocation3 + $0x340] sm:$0xff]  ;;  %185 = vmatpush.msra.mxu0 %v112_v9  ;;  %v149_v23 = vld [vmem:[#allocation3 + $0x2e8] sm:$0xff]  ;;  %v162_v62 = vld [vmem:[#allocation3 + $0x350] sm:$0xff] }
  0x10   :  { %208 = vmatpush.msra.mxu2 %v164_v10  ;;  %248 = vmatpush.msra.mxu3 %v165_v11  ;;  %v104_v15 = vld [vmem:[#allocation3 + $0x180] sm:$0xff]  ;;  %v145_v26 = vld [vmem:[#allocation3 + $0x2c8] sm:$0xff]  ;;  %v110_v63 = vld [vmem:[#allocation3 + $0x1b0] sm:$0xff] }
  0x11   :  { %v156_v16 = vld [vmem:[#allocation3 + $0x320] sm:$0xff]  ;;  %186 = vmatpush.msra.mxu0 %v108_v12  ;;  %v141_v29 = vld [vmem:[#allocation3 + $0x2a8] sm:$0xff]  ;;  %v158_v1 = vld [vmem:[#allocation3 + $0x330] sm:$0xff] }
  0x12   :  { %209 = vmatpush.msra.mxu2 %v160_v13  ;;  %249 = vmatpush.msra.mxu3 %v161_v14  ;;  %v100_v18 = vld [vmem:[#allocation3 + $0x160] sm:$0xff]  ;;  %v137_v32 = vld [vmem:[#allocation3 + $0x288] sm:$0xff]  ;;  %v106_v2 = vld [vmem:[#allocation3 + $0x190] sm:$0xff] }
  0x13   :  { %v152_v19 = vld [vmem:[#allocation3 + $0x300] sm:$0xff]  ;;  %187 = vmatpush.msra.mxu0 %v104_v15  ;;  %v133_v35 = vld [vmem:[#allocation3 + $0x268] sm:$0xff]  ;;  %v154_v4 = vld [vmem:[#allocation3 + $0x310] sm:$0xff] }
  0x14   :  { %210 = vmatpush.msra.mxu2 %v156_v16  ;;  %250 = vmatpush.msra.mxu3 %v157_v17  ;;  %v96_v21 = vld [vmem:[#allocation3 + $0x140] sm:$0xff]  ;;  %v129_v38 = vld [vmem:[#allocation3 + $0x248] sm:$0xff]  ;;  %v102_v5 = vld [vmem:[#allocation3 + $0x170] sm:$0xff] }
  0x15   :  { %v148_v22 = vld [vmem:[#allocation3 + $0x2e0] sm:$0xff]  ;;  %188 = vmatpush.msra.mxu0 %v100_v18  ;;  %v125_v41 = vld [vmem:[#allocation3 + $0x228] sm:$0xff]  ;;  %v150_v7 = vld [vmem:[#allocation3 + $0x2f0] sm:$0xff] }
  0x16   :  { %211 = vmatpush.msra.mxu2 %v152_v19  ;;  %251 = vmatpush.msra.mxu3 %v153_v20  ;;  %v92_v24 = vld [vmem:[#allocation3 + $0x120] sm:$0xff]  ;;  %v121_v44 = vld [vmem:[#allocation3 + $0x208] sm:$0xff]  ;;  %v98_v8 = vld [vmem:[#allocation3 + $0x150] sm:$0xff] }
  0x17   :  { %v144_v25 = vld [vmem:[#allocation3 + $0x2c0] sm:$0xff]  ;;  %189 = vmatpush.msra.mxu0 %v96_v21  ;;  %v117_v45 = vld [vmem:[#allocation3 + $0x1e8] sm:$0xff]  ;;  %v146_v10 = vld [vmem:[#allocation3 + $0x2d0] sm:$0xff] }
  0x18   :  { %212 = vmatpush.msra.mxu2 %v148_v22  ;;  %252 = vmatpush.msra.mxu3 %v149_v23  ;;  %v88_v27 = vld [vmem:[#allocation3 + $0x100] sm:$0xff]  ;;  %v113_v49 = vld [vmem:[#allocation3 + $0x1c8] sm:$0xff]  ;;  %v94_v11 = vld [vmem:[#allocation3 + $0x130] sm:$0xff] }
  0x19   :  { %v140_v28 = vld [vmem:[#allocation3 + $0x2a0] sm:$0xff]  ;;  %190 = vmatpush.msra.mxu0 %v92_v24  ;;  %v109_v52 = vld [vmem:[#allocation3 + $0x1a8] sm:$0xff]  ;;  %v142_v13 = vld [vmem:[#allocation3 + $0x2b0] sm:$0xff] }
  0x1a   :  { %213 = vmatpush.msra.mxu2 %v144_v25  ;;  %253 = vmatpush.msra.mxu3 %v145_v26  ;;  %v84_v30 = vld [vmem:[#allocation3 + $0xe0] sm:$0xff]  ;;  %v105_v55 = vld [vmem:[#allocation3 + $0x188] sm:$0xff]  ;;  %v90_v14 = vld [vmem:[#allocation3 + $0x110] sm:$0xff] }
  0x1b   :  { %v136_v31 = vld [vmem:[#allocation3 + $0x280] sm:$0xff]  ;;  %191 = vmatpush.msra.mxu0 %v88_v27  ;;  %v101_v58 = vld [vmem:[#allocation3 + $0x168] sm:$0xff]  ;;  %v138_v16 = vld [vmem:[#allocation3 + $0x290] sm:$0xff] }
  0x1c   :  { %214 = vmatpush.msra.mxu2 %v140_v28  ;;  %254 = vmatpush.msra.mxu3 %v141_v29  ;;  %v80_v33 = vld [vmem:[#allocation3 + $0xc0] sm:$0xff]  ;;  %v97_v61 = vld [vmem:[#allocation3 + $0x148] sm:$0xff]  ;;  %v86_v17 = vld [vmem:[#allocation3 + $0xf0] sm:$0xff] }
  0x1d   :  { %v132_v34 = vld [vmem:[#allocation3 + $0x260] sm:$0xff]  ;;  %192 = vmatpush.msra.mxu0 %v84_v30  ;;  %v93_v0 = vld [vmem:[#allocation3 + $0x128] sm:$0xff]  ;;  %v134_v19 = vld [vmem:[#allocation3 + $0x270] sm:$0xff] }
  0x1e   :  { %215 = vmatpush.msra.mxu2 %v136_v31  ;;  %255 = vmatpush.msra.mxu3 %v137_v32  ;;  %v76_v36 = vld [vmem:[#allocation3 + $0xa0] sm:$0xff]  ;;  %v89_v3 = vld [vmem:[#allocation3 + $0x108] sm:$0xff]  ;;  %v82_v20 = vld [vmem:[#allocation3 + $0xd0] sm:$0xff] }
  0x1f   :  { %v128_v37 = vld [vmem:[#allocation3 + $0x240] sm:$0xff]  ;;  %193 = vmatpush.msra.mxu0 %v80_v33  ;;  %v85_v6 = vld [vmem:[#allocation3 + $0xe8] sm:$0xff]  ;;  %v130_v22 = vld [vmem:[#allocation3 + $0x250] sm:$0xff] }
  0x20   :  { %216 = vmatpush.msra.mxu2 %v132_v34  ;;  %256 = vmatpush.msra.mxu3 %v133_v35  ;;  %v72_v39 = vld [vmem:[#allocation3 + $0x80] sm:$0xff]  ;;  %v81_v9 = vld [vmem:[#allocation3 + $0xc8] sm:$0xff]  ;;  %v78_v23 = vld [vmem:[#allocation3 + $0xb0] sm:$0xff] }
  0x21   :  { %v124_v40 = vld [vmem:[#allocation3 + $0x220] sm:$0xff]  ;;  %194 = vmatpush.msra.mxu0 %v76_v36  ;;  %v77_v12 = vld [vmem:[#allocation3 + $0xa8] sm:$0xff]  ;;  %v126_v25 = vld [vmem:[#allocation3 + $0x230] sm:$0xff] }
  0x22   :  { %217 = vmatpush.msra.mxu2 %v128_v37  ;;  %257 = vmatpush.msra.mxu3 %v129_v38  ;;  %v68_v42 = vld [vmem:[#allocation3 + $0x60] sm:$0xff]  ;;  %v73_v15 = vld [vmem:[#allocation3 + $0x88] sm:$0xff]  ;;  %v74_v26 = vld [vmem:[#allocation3 + $0x90] sm:$0xff] }
  0x23   :  { %v120_v43 = vld [vmem:[#allocation3 + $0x200] sm:$0xff]  ;;  %195 = vmatpush.msra.mxu0 %v72_v39  ;;  %v69_v18 = vld [vmem:[#allocation3 + $0x68] sm:$0xff]  ;;  %v122_v28 = vld [vmem:[#allocation3 + $0x210] sm:$0xff] }
  0x24   :  { %218 = vmatpush.msra.mxu2 %v124_v40  ;;  %258 = vmatpush.msra.mxu3 %v125_v41  ;;  %v64_v47 = vld [vmem:[#allocation3 + $0x40] sm:$0xff]  ;;  %v65_v21 = vld [vmem:[#allocation3 + $0x48] sm:$0xff]  ;;  %v1278_v29 = vld [vmem:[%s1504_s0] sm:$0xff] }
  0x25   :  { %196 = vmatpush.msra.mxu0 %v68_v42  ;;  %v1271_v48 = vld [vmem:[%s1504_s0 + $0x8] sm:$0xff]  ;;  %v61_v24 = vld [vmem:[#allocation3 + $0x28] sm:$0xff]  ;;  %v183_v30 = vld [vmem:[#allocation3 + $0x3f8] sm:$0xff] }
  0x26   :  { %219 = vmatpush.msra.mxu2 %v120_v43  ;;  %259 = vmatpush.msra.mxu3 %v121_v44  ;;  %v60_v51 = vld [vmem:[#allocation3 + $0x20] sm:$0xff]  ;;  %v57_v27 = vld [vmem:[#allocation3 + $0x8] sm:$0xff]  ;;  %v119_v31 = vld [vmem:[#allocation3 + $0x1f8] sm:$0xff] }
  0x27   :  { %197 = vmatpush.msra.mxu0 %v64_v47  ;;  %220 = vmatmul.f32.vlgmr.msra.gmra.mxu2 %v1271_v48  ;;  %v56_v54 = vld [vmem:[#allocation3] sm:$0xff]  ;;  %v179_v32 = vld [vmem:[#allocation3 + $0x3d8] sm:$0xff]  ;;  %v70_v33 = vld [vmem:[#allocation3 + $0x70] sm:$0xff] }
  0x28   :  { %224 = vmatpush.msrb.mxu2 %v117_v45  ;;  %284 = vmatpush.msrb.mxu3 %v182_v46  ;;  %v115_v34 = vld [vmem:[#allocation3 + $0x1d8] sm:$0xff]  ;;  %v66_v36 = vld [vmem:[#allocation3 + $0x50] sm:$0xff]  ;;  %v384_v42 = vld [vmem:[%s1509_s5 + $0x10] sm:$0xff] }
  0x29   :  { %198 = vmatpush.msra.mxu0 %v60_v51  ;;  %260 = vmatmul.f32.vlgmr.msra.gmra.mxu3 %v1271_v48  ;;  %v175_v35 = vld [vmem:[#allocation3 + $0x3b8] sm:$0xff]  ;;  %v385_v38 = vld [vmem:[%s1509_s5 + $0x18] sm:$0xff]  ;;  %v383_v47 = vld [vmem:[%s1509_s5 + $0x8] sm:$0xff] }
  0x2a   :  { %225 = vmatpush.msrb.mxu2 %v113_v49  ;;  %285 = vmatpush.msrb.mxu3 %v178_v50  ;;  %v111_v37 = vld [vmem:[#allocation3 + $0x1b8] sm:$0xff]  ;;  %v62_v40 = vld [vmem:[#allocation3 + $0x30] sm:$0xff] }
  0x2b   :  { %199 = vmatpush.msra.mxu0 %v56_v54  ;;  %v171_v39 = vld [vmem:[#allocation3 + $0x398] sm:$0xff]  ;;  %v58_v44 = vld [vmem:[#allocation3 + $0x10] sm:$0xff]  ;;  %606 = vmatpush.msra.mxu1 %v385_v38 }
  0x2c   :  { %226 = vmatpush.msrb.mxu2 %v109_v52  ;;  %286 = vmatpush.msrb.mxu3 %v174_v53  ;;  %v107_v41 = vld [vmem:[#allocation3 + $0x198] sm:$0xff] }
  0x2d   :  { %264 = vmatpush.msrb.mxu0 %v118_v57  ;;  %v167_v43 = vld [vmem:[#allocation3 + $0x378] sm:$0xff]  ;;  %607 = vmatpush.msra.mxu1 %v384_v42 }
  0x2e   :  { %227 = vmatpush.msrb.mxu2 %v105_v55  ;;  %287 = vmatpush.msrb.mxu3 %v170_v56  ;;  %v103_v45 = vld [vmem:[#allocation3 + $0x178] sm:$0xff] }
  0x2f   :  { %265 = vmatpush.msrb.mxu0 %v114_v60  ;;  %v163_v46 = vld [vmem:[#allocation3 + $0x358] sm:$0xff]  ;;  %608 = vmatpush.msra.mxu1 %v383_v47 }
  0x30   :  { %228 = vmatpush.msrb.mxu2 %v101_v58  ;;  %288 = vmatpush.msrb.mxu3 %v166_v59  ;;  %v99_v49 = vld [vmem:[#allocation3 + $0x158] sm:$0xff] }
  0x31   :  { %266 = vmatpush.msrb.mxu0 %v110_v63  ;;  %v159_v50 = vld [vmem:[#allocation3 + $0x338] sm:$0xff] }
  0x32   :  { %229 = vmatpush.msrb.mxu2 %v97_v61  ;;  %289 = vmatpush.msrb.mxu3 %v162_v62  ;;  %v95_v51 = vld [vmem:[#allocation3 + $0x138] sm:$0xff] }
  0x33   :  { %267 = vmatpush.msrb.mxu0 %v106_v2  ;;  %v155_v52 = vld [vmem:[#allocation3 + $0x318] sm:$0xff] }
  0x34   :  { %230 = vmatpush.msrb.mxu2 %v93_v0  ;;  %290 = vmatpush.msrb.mxu3 %v158_v1  ;;  %v91_v53 = vld [vmem:[#allocation3 + $0x118] sm:$0xff] }
  0x35   :  { %268 = vmatpush.msrb.mxu0 %v102_v5  ;;  %v151_v54 = vld [vmem:[#allocation3 + $0x2f8] sm:$0xff] }
  0x36   :  { %231 = vmatpush.msrb.mxu2 %v89_v3  ;;  %291 = vmatpush.msrb.mxu3 %v154_v4  ;;  %v87_v55 = vld [vmem:[#allocation3 + $0xf8] sm:$0xff] }
  0x37   :  { %269 = vmatpush.msrb.mxu0 %v98_v8  ;;  %v147_v56 = vld [vmem:[#allocation3 + $0x2d8] sm:$0xff] }
  0x38   :  { %232 = vmatpush.msrb.mxu2 %v85_v6  ;;  %292 = vmatpush.msrb.mxu3 %v150_v7  ;;  %v83_v57 = vld [vmem:[#allocation3 + $0xd8] sm:$0xff] }
  0x39   :  { %270 = vmatpush.msrb.mxu0 %v94_v11  ;;  %v143_v58 = vld [vmem:[#allocation3 + $0x2b8] sm:$0xff] }
  0x3a   :  { %233 = vmatpush.msrb.mxu2 %v81_v9  ;;  %293 = vmatpush.msrb.mxu3 %v146_v10  ;;  %v79_v59 = vld [vmem:[#allocation3 + $0xb8] sm:$0xff]  ;;  %v368_v10 = vld [vmem:[%s1506_s2 + $0x10] sm:$0xff] }
  0x3b   :  { %271 = vmatpush.msrb.mxu0 %v90_v14  ;;  %v139_v60 = vld [vmem:[#allocation3 + $0x298] sm:$0xff]  ;;  %477 = vst [vmem:[#allocation1 + $0x11] ss:$2 sm:$0xff] %v368_v10  ;;  %v456_v11 = vrot.slane %v368_v10, 4 }
  0x3c   :  { %234 = vmatpush.msrb.mxu2 %v77_v12  ;;  %294 = vmatpush.msrb.mxu3 %v142_v13  ;;  %v75_v61 = vld [vmem:[#allocation3 + $0x98] sm:$0xff]  ;;  %v369_v12 = vld [vmem:[%s1506_s2 + $0x18] sm:$0xf] }
  0x3d   :  { %272 = vmatpush.msrb.mxu0 %v86_v17  ;;  %v135_v62 = vld [vmem:[#allocation3 + $0x278] sm:$0xff]  ;;  %479 = vst [vmem:[#allocation1 + $0x20] ss:$2 sm:$0xff] %v456_v11  ;;  %v381_v11 = vld [vmem:[%s1506_s2 + $0x78] sm:$0xf] }
  0x3e   :  { %235 = vmatpush.msrb.mxu2 %v73_v15  ;;  %295 = vmatpush.msrb.mxu3 %v138_v16  ;;  %v71_v63 = vld [vmem:[#allocation3 + $0x78] sm:$0xff]  ;;  %481 = vst [vmem:[#allocation1 + $0x21] ss:$2 sm:$0xff] %v369_v12 }
  0x3f   :  { %273 = vmatpush.msrb.mxu0 %v82_v20  ;;  %v131_v0 = vld [vmem:[#allocation3 + $0x258] sm:$0xff]  ;;  %v401_v20 = vld [vmem:[%s1510_s6 + $0x78] sm:$0xff] }
  0x40   :  { %236 = vmatpush.msrb.mxu2 %v69_v18  ;;  %296 = vmatpush.msrb.mxu3 %v134_v19  ;;  %v67_v1 = vld [vmem:[#allocation3 + $0x58] sm:$0xff] }
  0x41   :  { %274 = vmatpush.msrb.mxu0 %v78_v23  ;;  %v127_v2 = vld [vmem:[#allocation3 + $0x238] sm:$0xff]  ;;  %v400_v23 = vld [vmem:[%s1510_s6 + $0x70] sm:$0xff] }
  0x42   :  { %237 = vmatpush.msrb.mxu2 %v65_v21  ;;  %297 = vmatpush.msrb.mxu3 %v130_v22  ;;  %v63_v3 = vld [vmem:[#allocation3 + $0x38] sm:$0xff]  ;;  %v371_v21 = vld [vmem:[%s1506_s2 + $0x28] sm:$0xf]  ;;  %v372_v22 = vld [vmem:[%s1506_s2 + $0x30] sm:$0xff] }
  0x43   :  { %275 = vmatpush.msrb.mxu0 %v74_v26  ;;  %v123_v4 = vld [vmem:[#allocation3 + $0x218] sm:$0xff] }
  0x44   :  { %238 = vmatpush.msrb.mxu2 %v61_v24  ;;  %298 = vmatpush.msrb.mxu3 %v126_v25  ;;  %v59_v5 = vld [vmem:[#allocation3 + $0x18] sm:$0xff]  ;;  %v399_v24 = vld [vmem:[%s1510_s6 + $0x68] sm:$0xff] }
  0x45   :  { %200 = vmatmul.f32.vlgmr.msra.gmra.mxu0 %v1278_v29  ;;  %v382_v6 = vld [vmem:[%s1509_s5] sm:$0xff]  ;;  %s974_s5 = sshll.u32 %s1203_s20, 4  ;;  %s975_s5 = int_to_ptr.vmem [resolvable:$true] %s974_s5 }
  0x46   :  { %239 = vmatpush.msrb.mxu2 %v57_v27  ;;  %299 = vmatpush.msrb.mxu3 %v122_v28  ;;  %v366_v7 = vld [vmem:[%s1506_s2] sm:$0xff]  ;;  %v397_v27 = vld [vmem:[%s1510_s6 + $0x58] sm:$0xff]  ;;  %v458_v28 = vrot.slane %v372_v22, 4 }
  0x47   :  { %240 = vmatmul.f32.vlgmr.msrb.gmra.mxu2 %v1278_v29  ;;  %276 = vmatpush.msrb.mxu0 %v70_v33  ;;  %v455_v8 = vrot.slane %v366_v7, 4  ;;  %471 = vst [vmem:[#allocation1] ss:$2 sm:$0xff] %v366_v7  ;;  %v370_v14 = vld [vmem:[%s1506_s2 + $0x20] sm:$0xff] }
  0x48   :  { %324 = vmatpush.msra.mxu3 %v183_v30  ;;  %304 = vmatpush.msra.mxu2 %v119_v31  ;;  %v457_v15 = vrot.slane %v370_v14, 4  ;;  %483 = vst [vmem:[#allocation1 + $0x30] ss:$2 sm:$0xff] %v370_v14  ;;  %v488_v16 = vld.sshfl [vmem:[#allocation1 + $0x20] sm:$0xff pattern:$0x75316420] }
  0x49   :  { %300 = vmatmul.f32.vlgmr.msrb.gmra.mxu3 %v1271_v48  ;;  %277 = vmatpush.msrb.mxu0 %v66_v36  ;;  %473 = vst [vmem:[#allocation1 + $0x1] ss:$2 sm:$0xff] %v455_v8  ;;  %v374_v17 = vld [vmem:[%s1506_s2 + $0x40] sm:$0xff]  ;;  %v373_v30 = vld [vmem:[%s1506_s2 + $0x38] sm:$0xf]  ;;  %v396_v31 = vld [vmem:[%s1510_s6 + $0x50] sm:$0xff] }
  0x4a   :  { %325 = vmatpush.msra.mxu3 %v179_v32  ;;  %305 = vmatpush.msra.mxu2 %v115_v34  ;;  %485 = vst [vmem:[#allocation1 + $0x31] ss:$2 sm:$0xff] %v457_v15  ;;  %v459_v18 = vrot.slane %v374_v17, 4  ;;  %v398_v26 = vld [vmem:[%s1510_s6 + $0x60] sm:$0xff] }
  0x4b   :  { %278 = vmatpush.msrb.mxu0 %v62_v40  ;;  %609 = vmatpush.msra.mxu1 %v382_v6  ;;  %494 = vst [vmem:[#allocation1 + $0x20] ss:$2 sm:$0xff] %v374_v17  ;;  %v394_v38 = vld [vmem:[%s1510_s6 + $0x40] sm:$0xff] }
  0x4c   :  { %326 = vmatpush.msra.mxu3 %v175_v35  ;;  %306 = vmatpush.msra.mxu2 %v111_v37  ;;  %495 = vst [vmem:[#allocation1 + $0x21] ss:$2 sm:$0xff] %v459_v18  ;;  %v395_v35 = vld [vmem:[%s1510_s6 + $0x48] sm:$0xff]  ;;  %v378_v7 = vld [vmem:[%s1506_s2 + $0x60] sm:$0xff] }
  0x4d   :  { %279 = vmatpush.msrb.mxu0 %v58_v44  ;;  %v461_v8 = vrot.slane %v378_v7, 4 }
  0x4e   :  { %327 = vmatpush.msra.mxu3 %v171_v39  ;;  %307 = vmatpush.msra.mxu2 %v107_v41  ;;  %v393_v41 = vld [vmem:[%s1510_s6 + $0x38] sm:$0xff] }
  0x4f   :  { %280 = vmatmul.f32.vlgmr.msrb.gmra.mxu0 %v1278_v29 }
  0x50   :  { %328 = vmatpush.msra.mxu3 %v167_v43  ;;  %308 = vmatpush.msra.mxu2 %v103_v45  ;;  %v486_v9 = vld.sshfl [vmem:[#allocation1] sm:$0xff pattern:$0x75316420] }
  0x51   :  { %1017 = vmatmul.msk.f32.vlgmr.msra.gmra.mxu1 %vm569_vm0, %v486_v9  ;;  %v489_v19 = vld.sshfl [vmem:[#allocation1 + $0x30] sm:$0xff pattern:$0x75316420]  ;;  %403 = vmatpush.msra.mxu0 %v401_v20  ;;  %490 = vst [vmem:[#allocation1] ss:$2 sm:$0xff] %v371_v21 }
  0x52   :  { %329 = vmatpush.msra.mxu3 %v163_v46  ;;  %309 = vmatpush.msra.mxu2 %v99_v49  ;;  %491 = vst [vmem:[#allocation1 + $0x1] ss:$2 sm:$0xff] %v372_v22  ;;  %v392_v46 = vld [vmem:[%s1510_s6 + $0x30] sm:$0xff]  ;;  %v391_v49 = vld [vmem:[%s1510_s6 + $0x28] sm:$0xff] }
  0x53   :  { %404 = vmatpush.msra.mxu0 %v400_v23  ;;  %v379_v9 = vld [vmem:[%s1506_s2 + $0x68] sm:$0xf] }
  0x54   :  { %330 = vmatpush.msra.mxu3 %v159_v50  ;;  %310 = vmatpush.msra.mxu2 %v95_v51  ;;  %v390_v51 = vld [vmem:[%s1510_s6 + $0x20] sm:$0xff] }
  0x55   :  { %405 = vmatpush.msra.mxu0 %v399_v24 }
  0x56   :  { %331 = vmatpush.msra.mxu3 %v155_v52  ;;  %311 = vmatpush.msra.mxu2 %v91_v53  ;;  %v500_v52 = vld.sshfl [vmem:[#allocation1 + $0x20] sm:$0xff pattern:$0x75316420]  ;;  %v375_v53 = vld [vmem:[%s1506_s2 + $0x48] sm:$0xf] }
  0x57   :  { %406 = vmatpush.msra.mxu0 %v398_v26  ;;  %496 = vst [vmem:[#allocation1 + $0x30] ss:$2 sm:$0xff] %v375_v53 }
  0x58   :  { %332 = vmatpush.msra.mxu3 %v151_v54  ;;  %312 = vmatpush.msra.mxu2 %v87_v55  ;;  %v389_v55 = vld [vmem:[%s1510_s6 + $0x18] sm:$0xff]  ;;  %506 = vst [vmem:[#allocation1 + $0x20] ss:$2 sm:$0xff] %v379_v9 }
  0x59   :  { %407 = vmatpush.msra.mxu0 %v397_v27  ;;  %v498_v34 = vld.sshfl [vmem:[#allocation1] sm:$0xff pattern:$0x75316420] }
  0x5a   :  { %333 = vmatpush.msra.mxu3 %v147_v56  ;;  %313 = vmatpush.msra.mxu2 %v83_v57  ;;  %v376_v56 = vld [vmem:[%s1506_s2 + $0x50] sm:$0xff] }
  0x5b   :  { %408 = vmatpush.msra.mxu0 %v396_v31  ;;  %497 = vst [vmem:[#allocation1 + $0x31] ss:$2 sm:$0xff] %v376_v56  ;;  %v365_v31 = vld [vmem:[%s1511_s7] sm:$0x3] }
  0x5c   :  { %334 = vmatpush.msra.mxu3 %v143_v58  ;;  %314 = vmatpush.msra.mxu2 %v79_v59 }
  0x5d   :  { %409 = vmatpush.msra.mxu0 %v395_v35 }
  0x5e   :  { %335 = vmatpush.msra.mxu3 %v139_v60  ;;  %315 = vmatpush.msra.mxu2 %v75_v61  ;;  %v388_v60 = vld [vmem:[%s1510_s6 + $0x10] sm:$0xff]  ;;  %v357_v61 = vld [vmem:[%s1505_s1] sm:$0xff] }
  0x5f   :  { %410 = vmatpush.msra.mxu0 %v394_v38 }
  0x60   :  { %336 = vmatpush.msra.mxu3 %v135_v62  ;;  %316 = vmatpush.msra.mxu2 %v71_v63 }
  0x61   :  { %411 = vmatpush.msra.mxu0 %v393_v41 }
  0x62   :  { %337 = vmatpush.msra.mxu3 %v131_v0  ;;  %317 = vmatpush.msra.mxu2 %v67_v1  ;;  %v387_v0 = vld [vmem:[%s1510_s6 + $0x8] sm:$0xff]  ;;  %v501_v6 = vld.sshfl [vmem:[#allocation1 + $0x30] sm:$0xff pattern:$0x75316420] }
  0x63   :  { %412 = vmatpush.msra.mxu0 %v392_v46  ;;  %509 = vst [vmem:[#allocation1 + $0x31] ss:$2 sm:$0xff] %v381_v11 }
  0x64   :  { %338 = vmatpush.msra.mxu3 %v127_v2  ;;  %318 = vmatpush.msra.mxu2 %v63_v3  ;;  %v386_v2 = vld [vmem:[%s1510_s6] sm:$0xff]  ;;  %v460_v3 = vrot.slane %v376_v56, 4 }
  0x65   :  { %413 = vmatpush.msra.mxu0 %v391_v49 }
  0x66   :  { %339 = vmatpush.msra.mxu3 %v123_v4  ;;  %319 = vmatpush.msra.mxu2 %v59_v5  ;;  %v377_v4 = vld [vmem:[%s1506_s2 + $0x58] sm:$0xf]  ;;  %502 = vst [vmem:[#allocation1] ss:$2 sm:$0xff] %v460_v3 }
  0x67   :  { %340 = vmatmul.f32.vlgmr.msra.gmra.mxu3 %v1271_v48  ;;  %320 = vmatmul.f32.vlgmr.msra.gmra.mxu2 %v1278_v29  ;;  %v367_v48 = vld [vmem:[%s1506_s2 + $0x8] sm:$0xf]  ;;  %503 = vst [vmem:[#allocation1 + $0x1] ss:$2 sm:$0xff] %v377_v4  ;;  %v1422_v4 = vperm.slane %v365_v31, 1 }
  0x68   :  { %475 = vst [vmem:[#allocation1 + $0x10] ss:$2 sm:$0xff] %v367_v48  ;;  %414 = vmatpush.msra.mxu0 %v390_v51  ;;  %v380_v48 = vld [vmem:[%s1506_s2 + $0x70] sm:$0xff] }
  0x69   :  { %v462_v10 = vrot.slane %v380_v48, 4  ;;  %507 = vst [vmem:[#allocation1 + $0x21] ss:$2 sm:$0xff] %v380_v48 }
  0x6a   :  { %415 = vmatpush.msra.mxu0 %v389_v55 }
  0x6b   :  { %508 = vst [vmem:[#allocation1 + $0x30] ss:$2 sm:$0xff] %v462_v10 }
  0x6c   :  { %416 = vmatpush.msra.mxu0 %v388_v60 }
  0x6e   :  { %417 = vmatpush.msra.mxu0 %v387_v0  ;;  %v510_v12 = vld.sshfl [vmem:[#allocation1] sm:$0xff pattern:$0x75316420] }
  0x6f   :  { %v487_v13 = vld.sshfl [vmem:[#allocation1 + $0x10] sm:$0xff pattern:$0x75316420] }
  0x70   :  { %1018 = vmatmul.msk.f32.gmra.mxu1 %vm569_vm0, %v487_v13  ;;  %492 = vst [vmem:[#allocation1 + $0x10] ss:$2 sm:$0xff] %v458_v28  ;;  %418 = vmatpush.msra.mxu0 %v386_v2  ;;  %v512_v18 = vld.sshfl [vmem:[#allocation1 + $0x20] sm:$0xff pattern:$0x75316420] }
  0x71   :  { %493 = vst [vmem:[#allocation1 + $0x11] ss:$2 sm:$0xff] %v373_v30 }
  0x72   :  { %v513_v24 = vld.sshfl [vmem:[#allocation1 + $0x30] sm:$0xff pattern:$0x75316420] }
  0x78   :  { %1019 = vmatmul.msk.f32.gmra.mxu1 %vm569_vm0, %v488_v16  ;;  %v499_v40 = vld.sshfl [vmem:[#allocation1 + $0x10] sm:$0xff pattern:$0x75316420] }
  0x79   :  { %504 = vst [vmem:[#allocation1 + $0x10] ss:$2 sm:$0xff] %v378_v7 }
  0x7a   :  { %505 = vst [vmem:[#allocation1 + $0x11] ss:$2 sm:$0xff] %v461_v8 }
  0x80   :  { %1020 = vmatmul.msk.f32.gmra.mxu1 %vm569_vm0, %v489_v19 }
  0x81   :  { %v511_v16 = vld.sshfl [vmem:[#allocation1 + $0x10] sm:$0xff pattern:$0x75316420] }
  0x88   :  { %1021 = vmatmul.msk.f32.gmra.mxu1 %vm569_vm0, %v498_v34 }
  0x90   :  { %1022 = vmatmul.msk.f32.gmra.mxu1 %vm569_vm0, %v499_v40 }
  0x98   :  { %1023 = vmatmul.msk.f32.gmra.mxu1 %vm569_vm0, %v500_v52 }
  0xa0   :  { %1024 = vmatmul.msk.f32.gmra.mxu1 %vm569_vm0, %v501_v6 }
  0xa8   :  { %1025 = vmatmul.msk.f32.gmra.mxu1 %vm569_vm0, %v510_v12  ;;  %v1428_v12 = vrot.slane %v1422_v4, 4 }
  0xaa   :  { %v221_v25 = vpop.f32.mrf.mxu2 }
  0xac   :  { %v261_v29 = vpop.f32.mrf.mxu3 }
  0xb0   :  { %1026 = vmatmul.msk.f32.gmra.mxu1 %vm569_vm0, %v511_v16 }
  0xb8   :  { %1027 = vmatmul.msk.f32.gmra.mxu1 %vm569_vm0, %v512_v18 }
  0xc0   :  { %1028 = vmatmul.msk.f32.gmra.mxu1 %vm569_vm0, %v513_v24 }
  0xc2   :  { %v201_v32 = vpop.f32.mrf.mxu0 }
  0xc3   :  { %v222_v33 = vadd.f32 %v221_v25, %v201_v32 }
  0xc5   :  { %v344_v36 = vmul.f32 0.5, %v222_v33  ;;  %v402_v33 = vperm.slane %v365_v31, 0 }
  0xc7   :  { %1035 = vtanh.f32 %v344_v36 }
  0xca   :  { %v241_v37 = vpop.f32.mrf.mxu2 }
  0xcb   :  { %v262_v39 = vadd.f32 %v261_v29, %v241_v37 }
  0xcc   :  { %v281_v43 = vpop.f32.mrf.mxu0  ;;  %v301_v44 = vpop.f32.mrf.mxu3 }
  0xcd   :  { %v348_v42 = vmul.f32 0.5, %v262_v39  ;;  %v302_v45 = vadd.f32 %v301_v44, %v281_v43  ;;  %v1036_v47 = vpop.eup %1035 }
  0xce   :  { %v346_v50 = vadd.f32 1.0, %v1036_v47  ;;  %v611_v25 = vpop.f32.mrf.mxu1 }
  0xcf   :  { %1037 = vtanh.f32 %v348_v42 }
  0xd0   :  { %1039 = vtanh.f32 %v302_v45  ;;  %v347_v54 = vmul.f32 0.5, %v346_v50 }
  0xd5   :  { %v1038_v57 = vpop.eup %1037 }
  0xd6   :  { %v1040_v58 = vpop.eup %1039  ;;  %v350_v59 = vadd.f32 1.0, %v1038_v57 }
  0xd7   :  { %v359_v63 = vmul.f32 %v1040_v58, %v347_v54 }
  0xd8   :  { %v351_v62 = vmul.f32 0.5, %v350_v59 }
  0xda   :  { %v358_v1 = vmul.f32 %v357_v61, %v351_v62 }
  0xdc   :  { %v360_v5 = vadd.f32 %v359_v63, %v358_v1 }
  0xde   :  { %363 = vst [vmem:[#allocation7] sm:$0xff] %v360_v5 }
  0xdf   :  { %990 = dma.vmem_to_hbm [thread:$0]  %s986_s19, 128, %s988_s17, [#allocation8]  }
  0xea   :  { %v341_v13 = vpop.f32.mrf.mxu3  ;;  %v321_v14 = vpop.f32.mrf.mxu2 }
  0xeb   :  { %v342_v15 = vadd.f32 %v341_v13, %v321_v14 }
  0xed   :  { %v353_v17 = vmul.f32 0.5, %v342_v15  ;;  %v614_v26 = vpop.f32.mrf.mxu1 }
  0xef   :  { %1041 = vtanh.f32 %v353_v17 }
  0xf0   :  { %1043 = vtanh.f32 %v360_v5 }
  0xf5   :  { %v1042_v19 = vpop.eup %1041  ;;  %v617_v27 = vpop.f32.mrf.mxu1 }
  0xf6   :  { %v355_v20 = vadd.f32 1.0, %v1042_v19  ;;  %v1044_v22 = vpop.eup %1043 }
  0xf8   :  { %v356_v21 = vmul.f32 0.5, %v355_v20 }
  0xfa   :  { %v362_v23 = vmul.f32 %v1044_v22, %v356_v21 }
  0xfc   :  { %364 = vst [vmem:[#allocation6] sm:$0xff] %v362_v23  ;;  %419 = vmatmul.f32.vlgmr.msra.gmra.mxu0 %v362_v23 }
  0xfd   :  { %v620_v28 = vpop.f32.mrf.mxu1  ;;  %979 = dma.vmem_to_hbm [thread:$0]  %s975_s5, 128, %s977_s23, [#allocation5]  }
 0x105   :  { %v1409_v29 = vpop.f32.mrf.mxu1 }
 0x10d   :  { %v1411_v30 = vpop.f32.mrf.mxu1 }
 0x115   :  { %v1416_v32 = vpop.f32.mrf.mxu1 }
 0x11d   :  { %v1418_v41 = vpop.f32.mrf.mxu1 }
 0x125   :  { %v1420_v52 = vpop.f32.mrf.mxu1 }
 0x12d   :  { %v1424_v8 = vpop.f32.mrf.mxu1 }
 0x179   :  { %v420_v34 = vpop.f32.mrf.mxu0 }
 0x17a   :  { %v421_v35 = vadd.f32 %v420_v34, %v402_v33 }
 0x17c   :  { %v424_v36 = vrot.slane %v421_v35, 1  ;;  %v425_v37 = vrot.slane %v421_v35, 2  ;;  %v431_v38 = vperm.slane %v421_v35, 0  ;;  %v426_v44 = vrot.slane %v421_v35, 3 }
 0x17d   :  { %v427_v46 = vrot.slane %v421_v35, 4  ;;  %v428_v50 = vrot.slane %v421_v35, 5  ;;  %v430_v59 = vrot.slane %v421_v35, 7  ;;  %v429_v0 = vrot.slane %v421_v35, 6 }
 0x17e   :  { %v432_v39 = vperm.slane %v424_v36, 0  ;;  %v433_v40 = vperm.slane %v425_v37, 0  ;;  %v463_v42 = vrot.slane %v431_v38, 4  ;;  %514 = vst [vmem:[#allocation1] ss:$2 sm:$0xff] %v431_v38  ;;  %v434_v47 = vperm.slane %v426_v44, 0 }
 0x17f   :  { %518 = vst [vmem:[#allocation1 + $0x10] ss:$2 sm:$0xff] %v431_v38  ;;  %v435_v49 = vperm.slane %v427_v46, 0  ;;  %v436_v60 = vperm.slane %v428_v50, 0  ;;  %v438_v3 = vperm.slane %v430_v59, 0  ;;  %v437_v9 = vperm.slane %v429_v0, 0 }
 0x180   :  { %v464_v43 = vrot.slane %v432_v39, 4  ;;  %516 = vst [vmem:[#allocation1 + $0x1] ss:$2 sm:$0xff] %v463_v42  ;;  %v465_v45 = vrot.slane %v433_v40, 4  ;;  %v466_v53 = vrot.slane %v434_v47, 4 }
 0x181   :  { %520 = vst [vmem:[#allocation1 + $0x11] ss:$2 sm:$0xff] %v432_v39  ;;  %v467_v56 = vrot.slane %v435_v49, 4  ;;  %v468_v2 = vrot.slane %v436_v60, 4  ;;  %v470_v11 = vrot.slane %v438_v3, 4  ;;  %v469_v18 = vrot.slane %v437_v9, 4 }
 0x182   :  { %522 = vst [vmem:[#allocation1 + $0x20] ss:$2 sm:$0xff] %v464_v43 }
 0x183   :  { %524 = vst [vmem:[#allocation1 + $0x21] ss:$2 sm:$0xff] %v432_v39 }
 0x184   :  { %526 = vst [vmem:[#allocation1 + $0x30] ss:$2 sm:$0xff] %v433_v40 }
 0x185   :  { %528 = vst [vmem:[#allocation1 + $0x31] ss:$2 sm:$0xff] %v465_v45 }
 0x187   :  { %v529_v51 = vld.sshfl [vmem:[#allocation1] sm:$0xff pattern:$0x75316420] }
 0x188   :  { %533 = vst [vmem:[#allocation1] ss:$2 sm:$0xff] %v433_v40  ;;  %v612_v54 = vadd.f32 %v611_v25, %v529_v51  ;;  %v530_v55 = vld.sshfl [vmem:[#allocation1 + $0x10] sm:$0xff pattern:$0x75316420] }
 0x189   :  { %534 = vst [vmem:[#allocation1 + $0x1] ss:$2 sm:$0xff] %v434_v47  ;;  %v615_v58 = vadd.f32 %v614_v26, %v530_v55 }
 0x18a   :  { %v531_v57 = vld.sshfl [vmem:[#allocation1 + $0x20] sm:$0xff pattern:$0x75316420]  ;;  %535 = vst [vmem:[#allocation1 + $0x10] ss:$2 sm:$0xff] %v466_v53  ;;  %v659_v63 = vrot.slane %v612_v54, 4  ;;  %1045 = vtanh.f32 %v612_v54 }
 0x18b   :  { %537 = vst [vmem:[#allocation1 + $0x20] ss:$2 sm:$0xff] %v435_v49  ;;  %v618_v62 = vadd.f32 %v617_v27, %v531_v57  ;;  %v660_v1 = vrot.slane %v615_v58, 4 }
 0x18c   :  { %538 = vst [vmem:[#allocation1 + $0x21] ss:$2 sm:$0xff] %v467_v56  ;;  %v532_v61 = vld.sshfl [vmem:[#allocation1 + $0x30] sm:$0xff pattern:$0x75316420]  ;;  %1047 = vtanh.f32 %v659_v63 }
 0x18d   :  { %539 = vst [vmem:[#allocation1 + $0x30] ss:$2 sm:$0xff] %v435_v49  ;;  %v661_v6 = vrot.slane %v618_v62, 4  ;;  %v621_v7 = vadd.f32 %v620_v28, %v532_v61  ;;  %1049 = vtanh.f32 %v660_v1 }
 0x18e   :  { %540 = vst [vmem:[#allocation1 + $0x31] ss:$2 sm:$0xff] %v436_v60  ;;  %1051 = vtanh.f32 %v618_v62 }
 0x18f   :  { %536 = vst [vmem:[#allocation1 + $0x11] ss:$2 sm:$0xff] %v434_v47  ;;  %1053 = vtanh.f32 %v661_v6  ;;  %v662_v15 = vrot.slane %v621_v7, 4 }
 0x190   :  { %v541_v5 = vld.sshfl [vmem:[#allocation1] sm:$0xff pattern:$0x75316420]  ;;  %v1046_v13 = vpop.eup %1045  ;;  %1055 = vtanh.f32 %v615_v58 }
 0x191   :  { %545 = vst [vmem:[#allocation1] ss:$2 sm:$0xff] %v468_v2  ;;  %v624_v10 = vadd.f32 %v1409_v29, %v541_v5  ;;  %1057 = vtanh.f32 %v621_v7  ;;  %v711_v22 = vmul.f32 %v1046_v13, %v1422_v4 }
 0x192   :  { %546 = vst [vmem:[#allocation1 + $0x1] ss:$2 sm:$0xff] %v436_v60  ;;  %v1048_v16 = vpop.eup %1047  ;;  %1059 = vtanh.f32 %v662_v15 }
 0x193   :  { %v543_v48 = vld.sshfl [vmem:[#allocation1 + $0x20] sm:$0xff pattern:$0x75316420]  ;;  %v663_v20 = vrot.slane %v624_v10, 4  ;;  %v1050_v21 = vpop.eup %1049  ;;  %v712_v25 = vmul.f32 %v1048_v16, %v1428_v12 }
 0x194   :  { %549 = vst [vmem:[#allocation1 + $0x20] ss:$2 sm:$0xff] %v437_v9  ;;  %v1052_v23 = vpop.eup %1051  ;;  %v630_v28 = vadd.f32 %v1416_v32, %v543_v48  ;;  %v714_v29 = vmul.f32 %v1050_v21, %v1422_v4 }
 0x195   :  { %v544_v14 = vld.sshfl [vmem:[#allocation1 + $0x30] sm:$0xff pattern:$0x75316420]  ;;  %550 = vst [vmem:[#allocation1 + $0x21] ss:$2 sm:$0xff] %v438_v3  ;;  %v1054_v27 = vpop.eup %1053  ;;  %1061 = vtanh.f32 %v663_v20  ;;  %v715_v34 = vmul.f32 %v1052_v23, %v1428_v12 }
 0x196   :  { %551 = vst [vmem:[#allocation1 + $0x30] ss:$2 sm:$0xff] %v470_v11  ;;  %v542_v17 = vld.sshfl [vmem:[#allocation1 + $0x10] sm:$0xff pattern:$0x75316420]  ;;  %v1056_v31 = vpop.eup %1055  ;;  %v633_v33 = vadd.f32 %v1418_v41, %v544_v14  ;;  %v716_v36 = vmul.f32 %v1054_v27, %v1422_v4  ;;  %v665_v32 = vrot.slane %v630_v28, 4 }
 0x197   :  { %552 = vst [vmem:[#allocation1 + $0x31] ss:$2 sm:$0xff] %v438_v3  ;;  %v627_v19 = vadd.f32 %v1411_v30, %v542_v17  ;;  %v641_v30 = vpop.f32.mrf.mxu1  ;;  %v1058_v37 = vpop.eup %1057  ;;  %v713_v42 = vmul.f32 %v1056_v31, %v1422_v4 }
 0x198   :  { %547 = vst [vmem:[#allocation1 + $0x10] ss:$2 sm:$0xff] %v437_v9  ;;  %v1060_v39 = vpop.eup %1059  ;;  %v666_v41 = vrot.slane %v633_v33, 4  ;;  %v717_v45 = vmul.f32 %v1058_v37, %v1422_v4 }
 0x199   :  { %v553_v24 = vld.sshfl [vmem:[#allocation1] sm:$0xff pattern:$0x75316420]  ;;  %548 = vst [vmem:[#allocation1 + $0x11] ss:$2 sm:$0xff] %v469_v18  ;;  %v664_v26 = vrot.slane %v627_v19, 4  ;;  %1063 = vtanh.f32 %v627_v19  ;;  %v718_v47 = vmul.f32 %v1060_v39, %v1428_v12 }
 0x19a   :  { %759 = vst [vmem:[#allocation1] ss:$2 sm:$0xff] %v711_v22  ;;  %v636_v40 = vadd.f32 %v1420_v52, %v553_v24 }
 0x19b   :  { %761 = vst [vmem:[#allocation1 + $0x1] ss:$2 sm:$0xff] %v712_v25  ;;  %1065 = vtanh.f32 %v664_v26  ;;  %v1062_v44 = vpop.eup %1061 }
 0x19c   :  { %v555_v35 = vld.sshfl [vmem:[#allocation1 + $0x20] sm:$0xff pattern:$0x75316420]  ;;  %1067 = vtanh.f32 %v624_v10  ;;  %v667_v51 = vrot.slane %v636_v40, 4  ;;  %v720_v54 = vmul.f32 %v1062_v44, %v1422_v4 }
 0x19d   :  { %767 = vst [vmem:[#allocation1 + $0x20] ss:$2 sm:$0xff] %v714_v29  ;;  %1069 = vtanh.f32 %v630_v28  ;;  %v642_v56 = vadd.f32 %v641_v30, %v555_v35 }
 0x19e   :  { %769 = vst [vmem:[#allocation1 + $0x21] ss:$2 sm:$0xff] %v715_v34  ;;  %v556_v38 = vld.sshfl [vmem:[#allocation1 + $0x30] sm:$0xff pattern:$0x75316420]  ;;  %1071 = vtanh.f32 %v665_v32 }
 0x19f   :  { %771 = vst [vmem:[#allocation1 + $0x30] ss:$2 sm:$0xff] %v716_v36  ;;  %v1064_v46 = vpop.eup %1063  ;;  %1073 = vtanh.f32 %v666_v41  ;;  %v644_v57 = vpop.f32.mrf.mxu1  ;;  %v669_v3 = vrot.slane %v642_v56, 4 }
 0x1a0   :  { %v554_v43 = vld.sshfl [vmem:[#allocation1 + $0x10] sm:$0xff pattern:$0x75316420]  ;;  %1075 = vtanh.f32 %v636_v40  ;;  %v721_v55 = vmul.f32 %v1064_v46, %v1428_v12  ;;  %v645_v1 = vadd.f32 %v644_v57, %v556_v38  ;;  %v862_v57 = vstv %s1512_s8 }
 0x1a1   :  { %763 = vst [vmem:[#allocation1 + $0x10] ss:$2 sm:$0xff] %v713_v42  ;;  %v1066_v50 = vpop.eup %1065  ;;  %v639_v53 = vadd.f32 %v1424_v8, %v554_v43  ;;  %1077 = vtanh.f32 %v633_v33 }
 0x1a2   :  { %v764_v49 = vld.sshfl [vmem:[#allocation1] sm:$0xff pattern:$0x75316420]  ;;  %v1068_v52 = vpop.eup %1067  ;;  %v722_v59 = vmul.f32 %v1066_v50, %v1422_v4  ;;  %1079 = vtanh.f32 %v667_v51  ;;  %v670_v11 = vrot.slane %v645_v1, 4 }
 0x1a3   :  { %820 = vadd.xlane.f32.xlu0 %v764_v49  ;;  %774 = vst [vmem:[#allocation1] ss:$2 sm:$0xff] %v717_v45  ;;  %v1070_v61 = vpop.eup %1069  ;;  %v668_v62 = vrot.slane %v639_v53, 4  ;;  %v719_v63 = vmul.f32 %v1068_v52, %v1422_v4  ;;  %1081 = vtanh.f32 %v639_v53 }
 0x1a4   :  { %775 = vst [vmem:[#allocation1 + $0x1] ss:$2 sm:$0xff] %v718_v47  ;;  %v1072_v0 = vpop.eup %1071  ;;  %v723_v7 = vmul.f32 %v1070_v61, %v1422_v4 }
 0x1a5   :  { %v772_v58 = vld.sshfl [vmem:[#allocation1 + $0x20] sm:$0xff pattern:$0x75316420]  ;;  %v1074_v5 = vpop.eup %1073  ;;  %1083 = vtanh.f32 %v668_v62  ;;  %v724_v48 = vmul.f32 %v1072_v0, %v1428_v12 }
 0x1a6   :  { %826 = vadd.xlane.f32.xlu1 %v772_v58  ;;  %779 = vst [vmem:[#allocation1 + $0x20] ss:$2 sm:$0xff] %v720_v54  ;;  %v773_v60 = vld.sshfl [vmem:[#allocation1 + $0x30] sm:$0xff pattern:$0x75316420]  ;;  %v1076_v8 = vpop.eup %1075  ;;  %v726_v14 = vmul.f32 %v1074_v5, %v1422_v4  ;;  %1085 = vtanh.f32 %v669_v3 }
 0x1a7   :  { %780 = vst [vmem:[#allocation1 + $0x21] ss:$2 sm:$0xff] %v721_v55  ;;  %v1078_v10 = vpop.eup %1077  ;;  %v828_v15 = vsel %vm822_vm1, %v773_v60, 0.0  ;;  %v727_v16 = vmul.f32 %v1076_v8, %v1428_v12  ;;  %1087 = vtanh.f32 %v642_v56  ;;  %v897_v55 = vlaneseq }
 0x1a8   :  { %v765_v2 = vld.sshfl [vmem:[#allocation1 + $0x10] sm:$0xff pattern:$0x75316420]  ;;  %781 = vst [vmem:[#allocation1 + $0x30] ss:$2 sm:$0xff] %v722_v59  ;;  %v1080_v13 = vpop.eup %1079  ;;  %v725_v18 = vmul.f32 %v1078_v10, %v1422_v4  ;;  %1089 = vtanh.f32 %v645_v1 }
 0x1a9   :  { %776 = vst [vmem:[#allocation1 + $0x10] ss:$2 sm:$0xff] %v719_v63  ;;  %v823_v6 = vsel %vm822_vm1, %v765_v2, 0.0  ;;  %v1082_v20 = vpop.eup %1081  ;;  %v728_v21 = vmul.f32 %v1080_v13, %v1422_v4  ;;  %1091 = vtanh.f32 %v670_v11  ;;  %v1470_v59 = vand.u32 127, %v897_v55 }
 0x1aa   :  { %v729_v25 = vmul.f32 %v1082_v20, %v1422_v4 }
 0x1ab   :  { %v777_v9 = vld.sshfl [vmem:[#allocation1] sm:$0xff pattern:$0x75316420]  ;;  %824 = vadd.xlane.f32.xlu0 %v823_v6  ;;  %v1084_v23 = vpop.eup %1083  ;;  %v900_v0 = vadd.s32 4294967288, %v1470_v59 }
 0x1ac   :  { %831 = vadd.xlane.f32.xlu2 %v777_v9  ;;  %784 = vst [vmem:[#allocation1] ss:$2 sm:$0xff] %v723_v7  ;;  %v1086_v24 = vpop.eup %1085  ;;  %v730_v28 = vmul.f32 %v1084_v23, %v1428_v12 }
 0x1ad   :  { %785 = vst [vmem:[#allocation1 + $0x1] ss:$2 sm:$0xff] %v724_v48  ;;  %v1088_v27 = vpop.eup %1087  ;;  %v732_v34 = vmul.f32 %v1086_v24, %v1422_v4 }
 0x1ae   :  { %829 = vadd.xlane.f32.xlu1 %v828_v15  ;;  %v782_v17 = vld.sshfl [vmem:[#allocation1 + $0x20] sm:$0xff pattern:$0x75316420]  ;;  %v1090_v30 = vpop.eup %1089  ;;  %v731_v35 = vmul.f32 %v1088_v27, %v1422_v4 }
 0x1af   :  { %789 = vst [vmem:[#allocation1 + $0x20] ss:$2 sm:$0xff] %v726_v14  ;;  %v783_v19 = vld.sshfl [vmem:[#allocation1 + $0x30] sm:$0xff pattern:$0x75316420]  ;;  %v1092_v33 = vpop.eup %1091  ;;  %v733_v37 = vmul.f32 %v1090_v30, %v1428_v12 }
 0x1b0   :  { %v778_v22 = vld.sshfl [vmem:[#allocation1 + $0x10] sm:$0xff pattern:$0x75316420]  ;;  %790 = vst [vmem:[#allocation1 + $0x21] ss:$2 sm:$0xff] %v727_v16  ;;  %v838_v31 = vsel %vm822_vm1, %v783_v19, 0.0  ;;  %v734_v32 = vmul.f32 %v1092_v33, %v1422_v4 }
 0x1b1   :  { %786 = vst [vmem:[#allocation1 + $0x10] ss:$2 sm:$0xff] %v725_v18  ;;  %v833_v26 = vsel %vm822_vm1, %v778_v22, 0.0 }
 0x1b2   :  { %791 = vst [vmem:[#allocation1 + $0x30] ss:$2 sm:$0xff] %v728_v21 }
 0x1b3   :  { %836 = vadd.xlane.f32.xlu0 %v782_v17 }
 0x1b4   :  { %834 = vadd.xlane.f32.xlu2 %v833_v26  ;;  %v787_v29 = vld.sshfl [vmem:[#allocation1] sm:$0xff pattern:$0x75316420] }
 0x1b5   :  { %794 = vst [vmem:[#allocation1] ss:$2 sm:$0xff] %v729_v25 }
 0x1b6   :  { %839 = vadd.xlane.f32.xlu1 %v838_v31  ;;  %795 = vst [vmem:[#allocation1 + $0x1] ss:$2 sm:$0xff] %v730_v28 }
 0x1b7   :  { %v792_v36 = vld.sshfl [vmem:[#allocation1 + $0x20] sm:$0xff pattern:$0x75316420] }
 0x1b8   :  { %v788_v38 = vld.sshfl [vmem:[#allocation1 + $0x10] sm:$0xff pattern:$0x75316420]  ;;  %799 = vst [vmem:[#allocation1 + $0x20] ss:$2 sm:$0xff] %v732_v34 }
 0x1b9   :  { %796 = vst [vmem:[#allocation1 + $0x10] ss:$2 sm:$0xff] %v731_v35  ;;  %v793_v39 = vld.sshfl [vmem:[#allocation1 + $0x30] sm:$0xff pattern:$0x75316420]  ;;  %v843_v40 = vsel %vm822_vm1, %v788_v38, 0.0 }
 0x1ba   :  { %800 = vst [vmem:[#allocation1 + $0x21] ss:$2 sm:$0xff] %v733_v37  ;;  %v848_v43 = vsel %vm822_vm1, %v793_v39, 0.0 }
 0x1bb   :  { %844 = vadd.xlane.f32.xlu0 %v843_v40  ;;  %801 = vst [vmem:[#allocation1 + $0x30] ss:$2 sm:$0xff] %v734_v32 }
 0x1bc   :  { %841 = vadd.xlane.f32.xlu2 %v787_v29 }
 0x1bd   :  { %v797_v42 = vld.sshfl [vmem:[#allocation1] sm:$0xff pattern:$0x75316420] }
 0x1be   :  { %846 = vadd.xlane.f32.xlu1 %v792_v36 }
 0x1c0   :  { %v798_v41 = vld.sshfl [vmem:[#allocation1 + $0x10] sm:$0xff pattern:$0x75316420] }
 0x1c1   :  { %v853_v12 = vsel %vm822_vm1, %v798_v41, 0.0  ;;  %v802_v45 = vld.sshfl [vmem:[#allocation1 + $0x20] sm:$0xff pattern:$0x75316420] }
 0x1c2   :  { %v803_v44 = vld.sshfl [vmem:[#allocation1 + $0x30] sm:$0xff pattern:$0x75316420] }
 0x1c3   :  { %851 = vadd.xlane.f32.xlu0 %v797_v42  ;;  %v858_v4 = vsel %vm822_vm1, %v803_v44, 0.0 }
 0x1c4   :  { %849 = vadd.xlane.f32.xlu2 %v848_v43  ;;  %v879_v43 = vld [vmem:[%s1507_s3] sm:$0xff] }
 0x1c5   :  { %vm880_vm10 = vcmp.gt.f32.partialorder %v879_v43, 0.5 }
 0x1c6   :  { %854 = vadd.xlane.f32.xlu1 %v853_v12 }
 0x1cb   :  { %859 = vadd.xlane.f32.xlu0 %v858_v4 }
 0x1cc   :  { %856 = vadd.xlane.f32.xlu2 %v802_v45 }
 0x216   :  { %v821_v46 = vpop.xlane.xlu0 %820 }
 0x217   :  { %v863_v2 = vadd.f32 %v862_v57, %v821_v46 }
 0x219   :  { %v827_v47 = vpop.xlane.xlu1 %826  ;;  %v899_v14 = vperm.slane %v863_v2, %v1470_v59 }
 0x21a   :  { %v865_v63 = vadd.f32 %v862_v57, %v827_v47 }
 0x21c   :  { %v904_v48 = vperm.slane %v865_v63, %v1470_v59 }
 0x21e   :  { %v825_v49 = vpop.xlane.xlu0 %824 }
 0x21f   :  { %v832_v50 = vpop.xlane.xlu2 %831  ;;  %v864_v1 = vadd.f32 %v862_v57, %v825_v49 }
 0x220   :  { %v867_v3 = vadd.f32 %v862_v57, %v832_v50 }
 0x221   :  { %v830_v51 = vpop.xlane.xlu1 %829  ;;  %v901_v10 = vperm.slane %v864_v1, %v900_v0 }
 0x222   :  { %v866_v60 = vadd.f32 %v862_v57, %v830_v51  ;;  %v907_v15 = vperm.slane %v867_v3, %v1470_v59 }
 0x223   :  { %v903_v25 = vsel %vm902_vm2, %v901_v10, %v899_v14 }
 0x224   :  { %v905_v5 = vperm.slane %v866_v60, %v900_v0 }
 0x226   :  { %v837_v53 = vpop.xlane.xlu0 %836  ;;  %v906_v17 = vsel %vm902_vm2, %v905_v5, %v904_v48 }
 0x227   :  { %v835_v52 = vpop.xlane.xlu2 %834  ;;  %v869_v11 = vadd.f32 %v862_v57, %v837_v53  ;;  %v926_v29 = vsel %vm925_vm3, %v906_v17, %v903_v25 }
 0x228   :  { %v868_v61 = vadd.f32 %v862_v57, %v835_v52 }
 0x229   :  { %v840_v54 = vpop.xlane.xlu1 %839  ;;  %v910_v26 = vperm.slane %v869_v11, %v1470_v59 }
 0x22a   :  { %v870_v6 = vadd.f32 %v862_v57, %v840_v54  ;;  %v908_v7 = vperm.slane %v868_v61, %v900_v0 }
 0x22c   :  { %v911_v18 = vperm.slane %v870_v6, %v900_v0  ;;  %v909_v21 = vsel %vm902_vm2, %v908_v7, %v907_v15 }
 0x22d   :  { %v928_v31 = vsel %vm927_vm4, %v909_v21, %v926_v29 }
 0x22e   :  { %v845_v56 = vpop.xlane.xlu0 %844  ;;  %v912_v33 = vsel %vm902_vm2, %v911_v18, %v910_v26 }
 0x22f   :  { %v842_v58 = vpop.xlane.xlu2 %841  ;;  %v872_v9 = vadd.f32 %v862_v57, %v845_v56  ;;  %v930_v32 = vsel %vm929_vm5, %v912_v33, %v928_v31 }
 0x230   :  { %v871_v8 = vadd.f32 %v862_v57, %v842_v58 }
 0x231   :  { %v847_v62 = vpop.xlane.xlu1 %846  ;;  %v914_v23 = vperm.slane %v872_v9, %v900_v0 }
 0x232   :  { %v873_v19 = vadd.f32 %v862_v57, %v847_v62  ;;  %v913_v22 = vperm.slane %v871_v8, %v1470_v59 }
 0x234   :  { %v916_v34 = vperm.slane %v873_v19, %v1470_v59  ;;  %v915_v35 = vsel %vm902_vm2, %v914_v23, %v913_v22 }
 0x235   :  { %v932_v12 = vsel %vm931_vm6, %v915_v35, %v930_v32 }
 0x236   :  { %v852_v13 = vpop.xlane.xlu0 %851 }
 0x237   :  { %v850_v16 = vpop.xlane.xlu2 %849  ;;  %v875_v30 = vadd.f32 %v862_v57, %v852_v13 }
 0x238   :  { %v874_v20 = vadd.f32 %v862_v57, %v850_v16 }
 0x239   :  { %v855_v24 = vpop.xlane.xlu1 %854  ;;  %v919_v39 = vperm.slane %v875_v30, %v1470_v59 }
 0x23a   :  { %v917_v27 = vperm.slane %v874_v20, %v900_v0  ;;  %v876_v28 = vadd.f32 %v862_v57, %v855_v24 }
 0x23c   :  { %v920_v36 = vperm.slane %v876_v28, %v900_v0  ;;  %v918_v37 = vsel %vm902_vm2, %v917_v27, %v916_v34 }
 0x23d   :  { %v934_v45 = vsel %vm933_vm7, %v918_v37, %v932_v12 }
 0x23e   :  { %v860_v38 = vpop.xlane.xlu0 %859  ;;  %v921_v4 = vsel %vm902_vm2, %v920_v36, %v919_v39 }
 0x23f   :  { %v878_v40 = vadd.f32 %v862_v57, %v860_v38  ;;  %v857_v42 = vpop.xlane.xlu2 %856  ;;  %v936_v49 = vsel %vm935_vm8, %v921_v4, %v934_v45 }
 0x240   :  { %v877_v41 = vadd.f32 %v862_v57, %v857_v42 }
 0x241   :  { %v923_v44 = vperm.slane %v878_v40, %v900_v0 }
 0x242   :  { %v922_v46 = vperm.slane %v877_v41, %v1470_v59 }
 0x244   :  { %v924_v47 = vsel %vm902_vm2, %v923_v44, %v922_v46 }
 0x245   :  { %v938_v50 = vsel %vm937_vm9, %v924_v47, %v936_v49 }
 0x246   :  { %v940_v51 = vsel %vm880_vm10, %v938_v50, -1e+30 }
 0x247   :  { %v942_v53 = vsel %vm941_vm11, %v940_v51, -inf }
 0x248   :  { %943 = vmax.xlane.f32.xlu1 %v942_v53 }
 0x2bb   :  { %v944_v52 = vpop.xlane.xlu1 %943 }
 0x2bc   :  { %v945_v54 = vsub.f32 %v940_v51, %v944_v52 }
 0x2be   :  { %v946_v55 = vmul.f32 1.442695, %v945_v54 }
 0x2c0   :  { %1093 = vpow2.f32 %v946_v55 }
 0x2c6   :  { %v1094_v56 = vpop.eup %1093 }
 0x2c7   :  { %v948_v57 = vmul.f32 %v1094_v56, %v879_v43 }
 0x2c9   :  { %v949_v58 = vsel %vm941_vm11, %v948_v57, 0.0 }
 0x2ca   :  { %950 = vadd.xlane.f32.xlu2 %v949_v58 }
 0x33d   :  { %v951_v59 = vpop.xlane.xlu2 %950 }
 0x33e   :  { %v952_v60 = vmax.f32 %v951_v59, 1e-30 }
 0x340   :  { %1095 = vrcp.f32 %v952_v60  ;;  %v964_v0 = vand.u32 2147483648, %v952_v60  ;;  %v962_v2 = vand.u32 2147483647, %v952_v60  ;;  %vm958_vm13 = vweird.f32 %v952_v60 }
 0x342   :  { %v965_v5 = vor.u32 1.1754944e-38, %v964_v0  ;;  %vm963_vm15 = vcmp.eq.f32.partialorder %v962_v2, 8.507059e+37 }
 0x346   :  { %v1096_v61 = vpop.eup %1095 }
 0x347   :  { %v954_v62 = vmul.f32 %v1096_v61, %v952_v60  ;;  %vm959_vm12 = vweird.f32 %v1096_v61 }
 0x348   :  { %vm960_vm14 = vmor %vm958_vm13, %vm959_vm12 }
 0x349   :  { %v955_v63 = vsub.f32 1.0, %v954_v62 }
 0x34b   :  { %v956_v1 = vmul.f32 %v1096_v61, %v955_v63 }
 0x34d   :  { %v957_v3 = vadd.f32 %v1096_v61, %v956_v1 }
 0x34f   :  { %v961_v6 = vsel %vm960_vm14, %v1096_v61, %v957_v3 }
 0x350   :  { %v966_v7 = vsel %vm963_vm15, %v965_v5, %v961_v6 }
 0x351   :  { %v967_v8 = vmul.f32 %v966_v7, %v948_v57 }
 0x353   :  { %968 = vst.msk [vmem:[#allocation9] sm:$0xff] %vm941_vm11, %v967_v8 }
 0x354   :  { %1001 = dma.vmem_to_hbm [thread:$0]  %s997_s4, 128, %s999_s25, [#allocation8]  }
 0x355   :  { %1195 = dma.done.wait [#allocation5], 128  }
 0x356   :  { %1196 = vsyncadd [#allocation5], 4294967168 }
 0x357   :  { %1197 = dma.done.wait [#allocation8], 256  }
 0x358   :  { %1198 = vsyncadd [#allocation8], 4294967040 }
 0x359   :  { %1014 = vsyncpa [#allocation4], 1 }
 0x35a   :  { %1015 = vsyncpa [#allocation5], 1 }
 0x35b   :  { %1016 = vsyncpa [#allocation8], 1 }

</bundles_post_ra>
